<compile_context>
chip_gen: v7x
topology: tpu7x:2x2x1
jax: 0.10.0
libtpu: 0.0.40
codegen_flags: <defaults>
</compile_context>

<pallas_src>
import jax
import jax.numpy as jnp
from jax.experimental import pallas as pl
from jax.experimental.pallas import tpu as pltpu

B = 2                      # batch
C_IN = 3                   # conv in channels
C_OUT = 3                  # conv out channels
H = W = 32                 # input spatial
NPIX = H * W               # 1024 pixels per channel (flat, lane axis)
PH = PW = 16               # pooled spatial
FEAT = C_OUT * PH * PW     # 768 true fc1 input features
H1, H2, H3 = 120, 84, 10   # true FC widths
PAD = 128                  # lane-dense padded FC width
KPOOL = C_OUT * NPIX - (W + 1)   # 3039: shifted-max length (needs taps up to +W+1)


# -----------------------------------------------------------------------------
# Fused kernel (single ungridded invocation, everything resident in VMEM):
#   x_ref  : (B, 3072)      VMEM  flat NCHW input (c*1024 + h*32 + w)
#   cw_ref : (3, 3)         SMEM  conv weight [out_c, in_c] (1x1 squeezed)
#   cb_ref : (3,)           SMEM  conv bias
#   w1_ref : (3039, 128)    VMEM  fc1.weight.T scattered to pooled lane slots, bf16
#   b1_ref : (1, 128)       VMEM  f32
#   w2_ref : (128, 128)     VMEM  fc2.weight.T zero-padded, bf16
#   b2_ref : (1, 128)       VMEM  f32
#   w3_ref : (128, 128)     VMEM  fc3.weight.T zero-padded, bf16
#   b3_ref : (1, 128)       VMEM  f32
#   o_ref  : (B, 128)       VMEM  padded logits (cols 10..127 are ~zero pad)
# -----------------------------------------------------------------------------
def net_kernel(x_ref, cw_ref, cb_ref, w1_ref, b1_ref, w2_ref, b2_ref,
               w3_ref, b3_ref, o_ref):
    x = x_ref[...]                                           # (B, 3072) f32, 24 KiB

    # 1x1 conv = per-pixel channel mix.  Input channel ic lives at lanes
    # [ic*1024, (ic+1)*1024); output channel oc is rebuilt at the same lanes
    # (aligned lane slices + aligned lane concat).
    xc = [x[:, ic * NPIX:(ic + 1) * NPIX] for ic in range(C_IN)]
    y = jnp.concatenate(
        [xc[0] * cw_ref[oc, 0] + xc[1] * cw_ref[oc, 1] + xc[2] * cw_ref[oc, 2]
         + cb_ref[oc]
         for oc in range(C_OUT)],
        axis=-1)                                             # (B, 3072) f32

    # Fused ReLU + 2x2 max-pool via lane-shifted maxima.  For pooled pixel
    # (c, h', w'), max of window taps {q, q+1, q+W, q+W+1} lands at lane
    # q = 1024*c + 2*h'*W + 2*w'.  Other lanes are garbage but hit all-zero
    # rows of w1.  ReLU commutes with max, so apply it once after pooling.
    m = jnp.maximum(jnp.maximum(y[:, 0:KPOOL],       y[:, 1:KPOOL + 1]),
                    jnp.maximum(y[:, W:KPOOL + W],   y[:, W + 1:KPOOL + W + 1]))
    pooled = jnp.maximum(m, 0.0).astype(jnp.bfloat16)        # (B, 3039)

    # fc1: ONE bf16 MXU matmul with f32 accumulation (weights pre-scattered).
    h1 = jnp.dot(pooled, w1_ref[...], preferred_element_type=jnp.float32)
    h1 = jnp.maximum(h1 + b1_ref[...], 0.0)                  # (B, 128) f32
    h2 = jnp.dot(h1.astype(jnp.bfloat16), w2_ref[...],
                 preferred_element_type=jnp.float32)
    h2 = jnp.maximum(h2 + b2_ref[...], 0.0)                  # (B, 128) f32
    o_ref[...] = (jnp.dot(h2.astype(jnp.bfloat16), w3_ref[...],
                          preferred_element_type=jnp.float32)
                  + b3_ref[...])                             # (B, 128) f32


@jax.jit
def net_forward(x_nchw, packed_params):
    conv_w, conv_b, w1s, b1p, w2p, b2p, w3p, b3p = packed_params

    # Free contiguous reshape (bitcast) — no transpose, no extra XLA launch.
    x_flat = x_nchw.reshape(B, C_IN * NPIX)                  # (B, 3072)

    # Returns the lane-dense padded (B, 128) logits; the [:, :10] slice is
    # deferred to the consumer (keeps this path to a single launch).
    return pl.pallas_call(
        net_kernel,
        out_shape=jax.ShapeDtypeStruct((B, PAD), jnp.float32),
        in_specs=[
            pl.BlockSpec(memory_space=pltpu.MemorySpace.VMEM),   # x
            pl.BlockSpec(memory_space=pltpu.MemorySpace.SMEM),   # conv w
            pl.BlockSpec(memory_space=pltpu.MemorySpace.SMEM),   # conv b
            pl.BlockSpec(memory_space=pltpu.MemorySpace.VMEM),   # w1 (scattered)
            pl.BlockSpec(memory_space=pltpu.MemorySpace.VMEM),   # b1
            pl.BlockSpec(memory_space=pltpu.MemorySpace.VMEM),   # w2
            pl.BlockSpec(memory_space=pltpu.MemorySpace.VMEM),   # b2
            pl.BlockSpec(memory_space=pltpu.MemorySpace.VMEM),   # w3
            pl.BlockSpec(memory_space=pltpu.MemorySpace.VMEM),   # b3
        ],
        out_specs=pl.BlockSpec(memory_space=pltpu.MemorySpace.VMEM),
    )(x_flat, conv_w, conv_b, w1s, b1p, w2p, b2p, w3p, b3p)


# -----------------------------------------------------------------------------
# Parameter construction (torch-default uniform init) + pack-time padding,
# scattering and bf16 down-cast for the fused lane-dense kernel.
# -----------------------------------------------------------------------------
def init_params(key):
    ks = jax.random.split(key, 8)

    def u(k, shape, fan_in):
        bound = 1.0 / jnp.sqrt(jnp.float32(fan_in))
        return jax.random.uniform(k, shape, jnp.float32, -bound, bound)

    conv_w = u(ks[0], (C_OUT, C_IN), C_IN)   # Conv2d(3,3,1) weight, 1x1 squeezed
    conv_b = u(ks[1], (C_OUT,), C_IN)
    w1 = u(ks[2], (FEAT, H1), FEAT)          # stored (in, out) == fc1.weight.T
    b1 = u(ks[3], (H1,), FEAT)
    w2 = u(ks[4], (H1, H2), H1)
    b2 = u(ks[5], (H2,), H1)
    w3 = u(ks[6], (H2, H3), H2)
    b3 = u(ks[7], (H3,), H2)
    return conv_w, conv_b, w1, b1, w2, b2, w3, b3


def pack_params(params):
    conv_w, conv_b, w1, b1, w2, b2, w3, b3 = params

    # Scatter fc1.weight.T row for feature f = c*256 + h'*16 + w' into the lane
    # position q = 1024*c + 2*h'*W + 2*w' where the in-kernel shifted-max leaves
    # the pooled value.  All other rows stay exactly zero.
    cc = jnp.arange(C_OUT)[:, None, None]
    hh = jnp.arange(PH)[None, :, None]
    ww = jnp.arange(PW)[None, None, :]
    q = (cc * NPIX + hh * (2 * W) + ww * 2).reshape(-1)          # (768,)
    w1s = jnp.zeros((KPOOL, PAD), jnp.float32).at[q, :H1].set(w1)

    b1p = jnp.zeros((1, PAD), jnp.float32).at[0, :H1].set(b1)
    w2p = jnp.zeros((PAD, PAD), jnp.float32).at[:H1, :H2].set(w2)
    b2p = jnp.zeros((1, PAD), jnp.float32).at[0, :H2].set(b2)
    w3p = jnp.zeros((PAD, PAD), jnp.float32).at[:H2, :H3].set(w3)
    b3p = jnp.zeros((1, PAD), jnp.float32).at[0, :H3].set(b3)

    # bf16 weights (halved DMA), f32 biases/activations, f32 MXU accumulation.
    return (conv_w, conv_b,
            w1s.astype(jnp.bfloat16), b1p,
            w2p.astype(jnp.bfloat16), b2p,
            w3p.astype(jnp.bfloat16), b3p)


def reference(x_nchw, params):
    # Pure-JAX f32 reference mirroring the PyTorch forward exactly.
    conv_w, conv_b, w1, b1, w2, b2, w3, b3 = params
    y = jnp.einsum("oi,bihw->bohw", conv_w, x_nchw) + conv_b[None, :, None, None]
    y = jnp.maximum(y, 0.0)
    y = y.reshape(B, C_OUT, PH, 2, PW, 2).max(axis=(3, 5))
    f = y.reshape(B, FEAT)
    h = jnp.maximum(f @ w1 + b1, 0.0)
    h = jnp.maximum(h @ w2 + b2, 0.0)
    return h @ w3 + b3


if __name__ == "__main__":
    key = jax.random.PRNGKey(0)
    kx, kp = jax.random.split(key)
    params = init_params(kp)
    packed = pack_params(params)
    x = jax.random.normal(kx, (B, C_IN, H, W), jnp.float32)

    out_padded = jax.block_until_ready(net_forward(x, packed))   # (B, 128)
    out = out_padded[:, :H3]                                     # deferred slice

    ref = reference(x, params)
    assert out.shape == (B, H3)
    max_err = jnp.max(jnp.abs(out - ref))
    # bf16 weights + bf16 MXU inputs (f32 accumulation) => relaxed tolerance.
    assert jnp.allclose(out, ref, atol=5e-2, rtol=5e-2), (
        f"mismatch vs reference, max err {max_err}")
    print("KERNEL_OK")
</pallas_src>

<mosaic_0001>
module attributes {stable_mosaic.version = 11 : i64} {
  func.func @net_kernel(%arg0: memref<2x3072xf32, #tpu.memory_space<vmem>>, %arg1: memref<3x3xf32, #tpu.memory_space<smem>>, %arg2: memref<3xf32, #tpu.memory_space<smem>>, %arg3: memref<3039x128xbf16, #tpu.memory_space<vmem>>, %arg4: memref<1x128xf32, #tpu.memory_space<vmem>>, %arg5: memref<128x128xbf16, #tpu.memory_space<vmem>>, %arg6: memref<1x128xf32, #tpu.memory_space<vmem>>, %arg7: memref<128x128xbf16, #tpu.memory_space<vmem>>, %arg8: memref<1x128xf32, #tpu.memory_space<vmem>>, %arg9: memref<2x128xf32, #tpu.memory_space<vmem>>) attributes {dimension_semantics = [], scalar_prefetch = 0 : i64, scratch_operands = 0 : i64, tpu.core_type = #tpu.core_type<tc>} {
    %c0 = arith.constant 0 : index
    %c0_0 = arith.constant 0 : index
    %0 = vector.load %arg0[%c0, %c0_0] : memref<2x3072xf32, #tpu.memory_space<vmem>>, vector<2x3072xf32>
    %1 = vector.extract_strided_slice %0 {offsets = [0, 0], sizes = [2, 1024], strides = [1, 1]} : vector<2x3072xf32> to vector<2x1024xf32>
    %2 = vector.extract_strided_slice %0 {offsets = [0, 1024], sizes = [2, 1024], strides = [1, 1]} : vector<2x3072xf32> to vector<2x1024xf32>
    %3 = vector.extract_strided_slice %0 {offsets = [0, 2048], sizes = [2, 1024], strides = [1, 1]} : vector<2x3072xf32> to vector<2x1024xf32>
    %c0_1 = arith.constant 0 : index
    %c0_2 = arith.constant 0 : index
    %4 = memref.load %arg1[%c0_1, %c0_2] : memref<3x3xf32, #tpu.memory_space<smem>>
    %5 = vector.broadcast %4 : f32 to vector<2x1024xf32>
    %6 = arith.mulf %1, %5 : vector<2x1024xf32>
    %c0_3 = arith.constant 0 : index
    %c1 = arith.constant 1 : index
    %7 = memref.load %arg1[%c0_3, %c1] : memref<3x3xf32, #tpu.memory_space<smem>>
    %8 = vector.broadcast %7 : f32 to vector<2x1024xf32>
    %9 = arith.mulf %2, %8 : vector<2x1024xf32>
    %10 = arith.addf %6, %9 : vector<2x1024xf32>
    %c0_4 = arith.constant 0 : index
    %c2 = arith.constant 2 : index
    %11 = memref.load %arg1[%c0_4, %c2] : memref<3x3xf32, #tpu.memory_space<smem>>
    %12 = vector.broadcast %11 : f32 to vector<2x1024xf32>
    %13 = arith.mulf %3, %12 : vector<2x1024xf32>
    %14 = arith.addf %10, %13 : vector<2x1024xf32>
    %c0_5 = arith.constant 0 : index
    %15 = memref.load %arg2[%c0_5] : memref<3xf32, #tpu.memory_space<smem>>
    %16 = vector.broadcast %15 : f32 to vector<2x1024xf32>
    %17 = arith.addf %14, %16 : vector<2x1024xf32>
    %c1_6 = arith.constant 1 : index
    %c0_7 = arith.constant 0 : index
    %18 = memref.load %arg1[%c1_6, %c0_7] : memref<3x3xf32, #tpu.memory_space<smem>>
    %19 = vector.broadcast %18 : f32 to vector<2x1024xf32>
    %20 = arith.mulf %1, %19 : vector<2x1024xf32>
    %c1_8 = arith.constant 1 : index
    %c1_9 = arith.constant 1 : index
    %21 = memref.load %arg1[%c1_8, %c1_9] : memref<3x3xf32, #tpu.memory_space<smem>>
    %22 = vector.broadcast %21 : f32 to vector<2x1024xf32>
    %23 = arith.mulf %2, %22 : vector<2x1024xf32>
    %24 = arith.addf %20, %23 : vector<2x1024xf32>
    %c1_10 = arith.constant 1 : index
    %c2_11 = arith.constant 2 : index
    %25 = memref.load %arg1[%c1_10, %c2_11] : memref<3x3xf32, #tpu.memory_space<smem>>
    %26 = vector.broadcast %25 : f32 to vector<2x1024xf32>
    %27 = arith.mulf %3, %26 : vector<2x1024xf32>
    %28 = arith.addf %24, %27 : vector<2x1024xf32>
    %c1_12 = arith.constant 1 : index
    %29 = memref.load %arg2[%c1_12] : memref<3xf32, #tpu.memory_space<smem>>
    %30 = vector.broadcast %29 : f32 to vector<2x1024xf32>
    %31 = arith.addf %28, %30 : vector<2x1024xf32>
    %c2_13 = arith.constant 2 : index
    %c0_14 = arith.constant 0 : index
    %32 = memref.load %arg1[%c2_13, %c0_14] : memref<3x3xf32, #tpu.memory_space<smem>>
    %33 = vector.broadcast %32 : f32 to vector<2x1024xf32>
    %34 = arith.mulf %1, %33 : vector<2x1024xf32>
    %c2_15 = arith.constant 2 : index
    %c1_16 = arith.constant 1 : index
    %35 = memref.load %arg1[%c2_15, %c1_16] : memref<3x3xf32, #tpu.memory_space<smem>>
    %36 = vector.broadcast %35 : f32 to vector<2x1024xf32>
    %37 = arith.mulf %2, %36 : vector<2x1024xf32>
    %38 = arith.addf %34, %37 : vector<2x1024xf32>
    %c2_17 = arith.constant 2 : index
    %c2_18 = arith.constant 2 : index
    %39 = memref.load %arg1[%c2_17, %c2_18] : memref<3x3xf32, #tpu.memory_space<smem>>
    %40 = vector.broadcast %39 : f32 to vector<2x1024xf32>
    %41 = arith.mulf %3, %40 : vector<2x1024xf32>
    %42 = arith.addf %38, %41 : vector<2x1024xf32>
    %c2_19 = arith.constant 2 : index
    %43 = memref.load %arg2[%c2_19] : memref<3xf32, #tpu.memory_space<smem>>
    %44 = vector.broadcast %43 : f32 to vector<2x1024xf32>
    %45 = arith.addf %42, %44 : vector<2x1024xf32>
    %46 = tpu.concatenate %17, %31, %45 in 1 : vector<2x1024xf32>, vector<2x1024xf32>, vector<2x1024xf32> -> vector<2x3072xf32>
    %47 = vector.extract_strided_slice %46 {offsets = [0, 0], sizes = [2, 3039], strides = [1, 1]} : vector<2x3072xf32> to vector<2x3039xf32>
    %48 = vector.extract_strided_slice %46 {offsets = [0, 1], sizes = [2, 3039], strides = [1, 1]} : vector<2x3072xf32> to vector<2x3039xf32>
    %49 = arith.maximumf %47, %48 : vector<2x3039xf32>
    %50 = vector.extract_strided_slice %46 {offsets = [0, 32], sizes = [2, 3039], strides = [1, 1]} : vector<2x3072xf32> to vector<2x3039xf32>
    %51 = vector.extract_strided_slice %46 {offsets = [0, 33], sizes = [2, 3039], strides = [1, 1]} : vector<2x3072xf32> to vector<2x3039xf32>
    %52 = arith.maximumf %50, %51 : vector<2x3039xf32>
    %53 = arith.maximumf %49, %52 : vector<2x3039xf32>
    %cst = arith.constant 0.000000e+00 : f32
    %54 = vector.broadcast %cst : f32 to vector<2x3039xf32>
    %55 = arith.maximumf %53, %54 : vector<2x3039xf32>
    %56 = arith.truncf %55 : vector<2x3039xf32> to vector<2x3039xbf16>
    %c0_20 = arith.constant 0 : index
    %c0_21 = arith.constant 0 : index
    %57 = vector.load %arg3[%c0_20, %c0_21] : memref<3039x128xbf16, #tpu.memory_space<vmem>>, vector<3039x128xbf16>
    %cst_22 = arith.constant dense<0.000000e+00> : vector<2x128xf32>
    %58 = tpu.matmul %56, %57, %cst_22 {dimension_numbers = #tpu.dot_dimension_numbers<[1], [0], [0], [1], [0, 0, 1, 1], [], []>} : vector<2x3039xbf16>, vector<3039x128xbf16>, vector<2x128xf32> -> vector<2x128xf32>
    %c0_23 = arith.constant 0 : index
    %c0_24 = arith.constant 0 : index
    %59 = vector.load %arg4[%c0_23, %c0_24] : memref<1x128xf32, #tpu.memory_space<vmem>>, vector<1x128xf32>
    %60 = vector.broadcast %59 : vector<1x128xf32> to vector<2x128xf32>
    %61 = arith.addf %58, %60 : vector<2x128xf32>
    %cst_25 = arith.constant 0.000000e+00 : f32
    %62 = vector.broadcast %cst_25 : f32 to vector<2x128xf32>
    %63 = arith.maximumf %61, %62 : vector<2x128xf32>
    %64 = arith.truncf %63 : vector<2x128xf32> to vector<2x128xbf16>
    %c0_26 = arith.constant 0 : index
    %c0_27 = arith.constant 0 : index
    %65 = vector.load %arg5[%c0_26, %c0_27] : memref<128x128xbf16, #tpu.memory_space<vmem>>, vector<128x128xbf16>
    %cst_28 = arith.constant dense<0.000000e+00> : vector<2x128xf32>
    %66 = tpu.matmul %64, %65, %cst_28 {dimension_numbers = #tpu.dot_dimension_numbers<[1], [0], [0], [1], [0, 0, 1, 1], [], []>} : vector<2x128xbf16>, vector<128x128xbf16>, vector<2x128xf32> -> vector<2x128xf32>
    %c0_29 = arith.constant 0 : index
    %c0_30 = arith.constant 0 : index
    %67 = vector.load %arg6[%c0_29, %c0_30] : memref<1x128xf32, #tpu.memory_space<vmem>>, vector<1x128xf32>
    %68 = vector.broadcast %67 : vector<1x128xf32> to vector<2x128xf32>
    %69 = arith.addf %66, %68 : vector<2x128xf32>
    %cst_31 = arith.constant 0.000000e+00 : f32
    %70 = vector.broadcast %cst_31 : f32 to vector<2x128xf32>
    %71 = arith.maximumf %69, %70 : vector<2x128xf32>
    %72 = arith.truncf %71 : vector<2x128xf32> to vector<2x128xbf16>
    %c0_32 = arith.constant 0 : index
    %c0_33 = arith.constant 0 : index
    %73 = vector.load %arg7[%c0_32, %c0_33] : memref<128x128xbf16, #tpu.memory_space<vmem>>, vector<128x128xbf16>
    %cst_34 = arith.constant dense<0.000000e+00> : vector<2x128xf32>
    %74 = tpu.matmul %72, %73, %cst_34 {dimension_numbers = #tpu.dot_dimension_numbers<[1], [0], [0], [1], [0, 0, 1, 1], [], []>} : vector<2x128xbf16>, vector<128x128xbf16>, vector<2x128xf32> -> vector<2x128xf32>
    %c0_35 = arith.constant 0 : index
    %c0_36 = arith.constant 0 : index
    %75 = vector.load %arg8[%c0_35, %c0_36] : memref<1x128xf32, #tpu.memory_space<vmem>>, vector<1x128xf32>
    %76 = vector.broadcast %75 : vector<1x128xf32> to vector<2x128xf32>
    %77 = arith.addf %74, %76 : vector<2x128xf32>
    %c0_37 = arith.constant 0 : index
    %c0_38 = arith.constant 0 : index
    %78 = vector.load %arg9[%c0_37, %c0_38] : memref<2x128xf32, #tpu.memory_space<vmem>>, vector<2x128xf32>
    tpu.vector_store %arg9[%c0_37, %c0_38], %77 {strides = array<i32>} : memref<2x128xf32, #tpu.memory_space<vmem>>, vector<2x128xf32>,
    return
  }
}

</mosaic_0001>

<bundles_post_ra>
// kernel: net_forward.1
= control target key start
LH: loop header
LB: loop body
LE: loop exit
PB: predicated region body
PF: predicated region fallthrough
CT: control target
= control target key end

     0   :  { %14 = vsyncpa [#allocation5], 0  ;;  %s4457_s0 = inlined_call_operand.vmem [shape: f32[2,3072], index: 0, kind: input, shape index: {}]   ;;  %s4458_s1 = inlined_call_operand.vmem [shape: f32[3,3], index: 1, kind: input, shape index: {}]   ;;  %s4459_s2 = inlined_call_operand.vmem [shape: f32[3], index: 2, kind: input, shape index: {}]   ;;  %s4460_s3 = inlined_call_operand.hbm [shape: bf16[3039,128], index: 3, kind: input, shape index: {}]   ;;  %s4461_s4 = inlined_call_operand.vmem [shape: f32[1,128], index: 4, kind: input, shape index: {}]   ;;  %s4462_s5 = inlined_call_operand.vmem [shape: bf16[128,128], index: 5, kind: input, shape index: {}]   ;;  %s4463_s6 = inlined_call_operand.vmem [shape: f32[1,128], index: 6, kind: input, shape index: {}]   ;;  %s4464_s7 = inlined_call_operand.vmem [shape: bf16[128,128], index: 7, kind: input, shape index: {}]   ;;  %s4465_s8 = inlined_call_operand.vmem [shape: f32[1,128], index: 8, kind: input, shape index: {}]   ;;  %s4466_s9 = inlined_call_operand.hbm [shape: f32[2,128], index: 9, kind: output, shape index: {}]  }
   0x1   :  { %15 = vsyncpa [#allocation7], 0 }
   0x2   :  { %16 = vsyncpa [#allocation3], 0 }
   0x3   :  { %17 = vsyncpa [#allocation4], 0  ;;  %s26_s11 = sshll.u32 %s4458_s1, 4  ;;  %s36_s14 = sshll.u32 %s4459_s2, 4  ;;  %s27_s11 = int_to_ptr.vmem [resolvable:$true] %s26_s11  ;;  %s37_s14 = int_to_ptr.vmem [resolvable:$true] %s36_s14 }
   0x4   :  { %s3681_s15 = scalar_lea.vmem %s27_s11, 64  ;;  %p3686_p1 = scmp.lt.s32.totalorder %s27_s11, %s27_s11 }
   0x5   :  { %p3682_p0 = scmp.ne.s32.totalorder %s27_s11, %s3681_s15  ;;  %p3687_p2 = scmp.lt.s32.totalorder %s3681_s15, %s3681_s15 }
   0x7   :  { %p3688_p3 = por %p3687_p2, %p3686_p1 }
   0x9   :  { %p3689_p4 = pnand %p3688_p3, %p3682_p0 }
   0xb   :  { %3692 = shalt.err (!%p3689_p4)
}
   0xc   :  { %s3757_s16 = smov [#allocation2]   ;;  %s3693_s17 = scalar_lea.vmem %s37_s14, 16 }
   0xd   :  { %29 = dma.vmem_to_smem %s27_s11, 64, %s3757_s16, [#allocation5]  }
   0xe   :  { %p3694_p5 = scmp.ne.s32.totalorder %s37_s14, %s3693_s17  ;;  %p3698_p6 = scmp.lt.s32.totalorder %s37_s14, %s37_s14 }
   0xf   :  { %p3699_p7 = scmp.lt.s32.totalorder %s3693_s17, %s3693_s17 }
  0x11   :  { %p3700_p8 = por %p3699_p7, %p3698_p6 }
  0x13   :  { %p3701_p9 = pnand %p3700_p8, %p3694_p5 }
  0x15   :  { %3704 = shalt.err (!%p3701_p9)
}
  0x16   :  { %s3758_s1 = smov [#allocation6]   ;;  %s3759_s2 = smov [#allocation8]  }
  0x17   :  { %39 = dma.vmem_to_smem %s37_s14, 16, %s3758_s1, [#allocation7]  }
  0x18   :  { %s45_s18 = sshll.u32 %s3759_s2, 4  ;;  %s3705_s21 = scalar_lea.hbm %s4460_s3, 24320  ;;  %s46_s18 = int_to_ptr.vmem [resolvable:$true] %s45_s18 }
  0x19   :  { %p3706_p10 = scmp.ne.s32.totalorder %s4460_s3, %s3705_s21  ;;  %p3709_p11 = scmp.lt.u32.totalorder %s3705_s21, %s4460_s3 }
  0x1b   :  { %p3711_p12 = pnand %p3709_p11, %p3706_p10 }
  0x1d   :  { %3714 = shalt.err (!%p3711_p12)
}
  0x1e   :  { %s3715_s26 = scalar_lea.vmem %s46_s18, 24320  ;;  %p3720_p0 = scmp.lt.s32.totalorder %s46_s18, %s46_s18 }
  0x1f   :  { %p3716_p13 = scmp.ne.s32.totalorder %s46_s18, %s3715_s26  ;;  %p3721_p1 = scmp.lt.s32.totalorder %s3715_s26, %s3715_s26 }
  0x21   :  { %p3722_p2 = por %p3721_p1, %p3720_p0 }
  0x23   :  { %p3723_p3 = pnand %p3722_p2, %p3716_p13 }
  0x25   :  { %3726 = shalt.err (!%p3723_p3)
}
  0x26   :  { %s3760_s27 = smov 64   ;;  %s3761_s28 = smov 4  }
  0x27   :  { %51 = dma.hbm_to_vmem [thread:$0]  %s4460_s3, 24320, %s46_s18, [#allocation3], %s3760_s27, %s3760_s27, %s3761_s28  }
  0x28   :  { %3749 = dma.done.wait [#allocation5], 64  }
  0x29   :  { %3750 = vsyncadd [#allocation5], 4294967232 }
  0x2a   :  { %3751 = dma.done.wait [#allocation7], 16  }
  0x2b   :  { %3752 = vsyncadd [#allocation7], 4294967280 }
  0x2c   :  { %3753 = dma.done.wait [#allocation3], 24320  }
  0x2d   :  { %3754 = vsyncadd [#allocation3], 4294942976 }
  0x2e   :  { %71 = sfence }
  0x2f   :  { %s79_s10 = sld [smem:[#allocation2]]  ;;  %v145_v0 = vlaneseq  ;;  %s2844_s11 = sld [smem:[#allocation2 + $0x1]]  ;;  %v3841_v1 = vld [vmem:[%s4457_s0] sm:$0xff]  ;;  %v74_v2 = vld [vmem:[%s4457_s0 + $0x8] sm:$0xff]  ;;  %v3851_v3 = vld [vmem:[%s4457_s0 + $0x10] sm:$0xff]  ;;  %vm319_vm0 = vcmask 1039360  }
  0x30   :  { %s2845_s3 = sld [smem:[#allocation2 + $0x2]]  ;;  %s3846_s16 = sld [smem:[#allocation6]]  ;;  %v76_v4 = vld [vmem:[%s4457_s0 + $0x18] sm:$0xff]  ;;  %v3859_v6 = vld [vmem:[%s4457_s0 + $0x20] sm:$0xff]  ;;  %v78_v7 = vld [vmem:[%s4457_s0 + $0x28] sm:$0xff]  ;;  %vm463_vm1 = vcmask 785408  }
  0x31   :  { %v146_v5 = vshrl.u32 %v145_v0, 7  ;;  %s2846_s19 = sld [smem:[#allocation2 + $0x80]]  ;;  %s2847_s20 = sld [smem:[#allocation2 + $0x81]]  ;;  %v3762_v8 = vmov 1983009808   ;;  %vm2109_vm2 = vcmask 777216  }
  0x32   :  { %v143_v9 = vunpack.c.l.s4 %v3762_v8  ;;  %s2848_s25 = sld [smem:[#allocation2 + $0x82]]  ;;  %s3864_s26 = sld [smem:[#allocation6 + $0x1]]  ;;  %v3474_v8 = vld [vmem:[#allocation8 + $0xc8] sm:$0xff]   ;;  %vm2113_vm3 = vcmask 1046528   ;;  %vm2114_vm4 = vcmask 1047552   ;;  %vm3768_vm5 = vmmov 0  }
  0x33   :  { %s3875_s27 = sld [smem:[#allocation2 + $0x100]]  ;;  %s3877_s28 = sld [smem:[#allocation2 + $0x101]] }
  0x34   :  { %v144_v17 = vunpack.c.0.s8 %v143_v9  ;;  %s3880_s29 = sld [smem:[#allocation2 + $0x102]]  ;;  %s3763_s30 = smov 127   ;;  %v3476_v9 = vld [vmem:[#allocation8 + $0x40] sm:$0xff]  }
  0x35   :  { %v80_v10 = vstv %s79_s10  ;;  %v84_v13 = vstv %s2844_s11  ;;  %3064 = vmatprep.subr.bf16.mxu0 %v3476_v9  ;;  %s3953_s10 = sld [smem:[#allocation6 + $0x2]]  ;;  %s3764_s11 = smov 96  }
  0x36   :  { %v81_v11 = vmul.f32 %v80_v10, %v3841_v1  ;;  %v82_v12 = vmul.f32 %v80_v10, %v74_v2  ;;  %v85_v14 = vmul.f32 %v84_v13, %v3851_v3  ;;  %v86_v15 = vmul.f32 %v84_v13, %v76_v4  ;;  %v3478_v10 = vld [vmem:[#allocation8] sm:$0xff]   ;;  %v3482_v13 = vld [vmem:[#allocation8 + $0x8] sm:$0xff]   ;;  %s3769_s24 = smov [#allocation9]  }
  0x37   :  { %v90_v16 = vstv %s2845_s3  ;;  %v100_v20 = vstv %s2846_s19  ;;  %v104_v21 = vstv %s2847_s20  ;;  %v96_v26 = vstv %s3846_s16  ;;  %3065 = vmatpush3.bf16.msra.mxu0 %v3478_v10 }
  0x38   :  { %v91_v18 = vmul.f32 %v90_v16, %v3859_v6  ;;  %v92_v19 = vmul.f32 %v90_v16, %v78_v7  ;;  %v87_v22 = vadd.f32 %v85_v14, %v81_v11  ;;  %v88_v23 = vadd.f32 %v86_v15, %v82_v12  ;;  %v3480_v11 = vld [vmem:[#allocation8 + $0x48] sm:$0xff]   ;;  %v3477_v12 = vld [vmem:[#allocation8 + $0xd0] sm:$0xff]   ;;  %v3481_v16 = vld [vmem:[#allocation8 + $0xd8] sm:$0xff]  }
  0x39   :  { %v101_v24 = vmul.f32 %v100_v20, %v3841_v1  ;;  %v105_v25 = vmul.f32 %v104_v21, %v3851_v3  ;;  %v110_v27 = vstv %s2848_s25  ;;  %v102_v28 = vmul.f32 %v100_v20, %v74_v2  ;;  %v3479_v14 = vld [vmem:[#allocation8 + $0x90] sm:$0xff]   ;;  %3066 = vmatprep.subr.bf16.mxu0 %v3480_v11  ;;  %v3485_v20 = vld [vmem:[#allocation8 + $0xe0] sm:$0xff]   ;;  %s2833_s25 = sshll.u32 %s3769_s24, 4  ;;  %s2834_s25 = int_to_ptr.vmem [resolvable:$true] %s2833_s25 }
  0x3a   :  { %v106_v29 = vmul.f32 %v104_v21, %v76_v4  ;;  %v93_v30 = vadd.f32 %v91_v18, %v87_v22  ;;  %v94_v31 = vadd.f32 %v92_v19, %v88_v23  ;;  %v111_v33 = vmul.f32 %v110_v27, %v3859_v6  ;;  %v3484_v15 = vld [vmem:[#allocation8 + $0x50] sm:$0xff]   ;;  %v3488_v18 = vld [vmem:[#allocation8 + $0x58] sm:$0xff]   ;;  %v3487_v21 = vld [vmem:[#allocation8 + $0xa0] sm:$0xff]   ;;  %p3732_p5 = scmp.lt.s32.totalorder %s2834_s25, %s2834_s25 }
  0x3b   :  { %v107_v32 = vadd.f32 %v105_v25, %v101_v24  ;;  %v3873_v34 = vsub.s32 %v144_v17, %v146_v5  ;;  %v112_v36 = vmul.f32 %v110_v27, %v78_v7  ;;  %v116_v40 = vstv %s3864_s26  ;;  %v3472_v5 = vld [vmem:[#allocation8 + $0xc0] sm:$0xff]   ;;  %v3486_v17 = vld [vmem:[#allocation8 + $0x10] sm:$0xff]   ;;  %3067 = vmatpush3.bf16.msra.mxu0 %v3482_v13  ;;  %v3483_v19 = vld [vmem:[#allocation8 + $0x98] sm:$0xff]  }
  0x3c   :  { %v108_v35 = vadd.f32 %v106_v29, %v102_v28  ;;  %v97_v37 = vadd.f32 %v96_v26, %v93_v30  ;;  %v98_v38 = vadd.f32 %v96_v26, %v94_v31  ;;  %v120_v52 = vstv %s3875_s27  ;;  %v3473_v7 = vld [vmem:[#allocation8 + $0x80] sm:$0xff]   ;;  %3086 = vmatprep.subr.bf16.mxu1 %v3472_v5  ;;  %3068 = vmatprep.subr.bf16.mxu0 %v3484_v15  ;;  %v3489_v22 = vld [vmem:[#allocation8 + $0xe8] sm:$0xff]   ;;  %v3490_v23 = vld [vmem:[#allocation8 + $0x18] sm:$0xff]  }
  0x3d   :  { %v113_v39 = vadd.f32 %v111_v33, %v107_v32  ;;  %v121_v57 = vmul.f32 %v120_v52, %v3841_v1  ;;  %v124_v60 = vstv %s3877_s28  ;;  %v130_v61 = vstv %s3880_s29  ;;  %3087 = vmatpush3.bf16.msra.mxu1 %v3473_v7  ;;  %v3491_v24 = vld [vmem:[#allocation8 + $0xa8] sm:$0xff]   ;;  %v3492_v27 = vld [vmem:[#allocation8 + $0x60] sm:$0xff]   ;;  %v3493_v28 = vld [vmem:[#allocation8 + $0xf0] sm:$0xff]  }
  0x3e   :  { %v114_v41 = vadd.f32 %v112_v36, %v108_v35  ;;  %v141_v42 = vcombine.high %v97_v37, %v97_v37  ;;  %v158_v43 = vcombine.high %v98_v38, %v98_v38  ;;  %v3883_v44 = vrot.slane %v97_v37, %v3873_v34  ;;  %3088 = vmatprep.subr.bf16.mxu1 %v3474_v8  ;;  %v3494_v29 = vld [vmem:[#allocation8 + $0x20] sm:$0xff]   ;;  %v3495_v30 = vld [vmem:[#allocation8 + $0xb0] sm:$0xff]  }
  0x3f   :  { %v3886_v45 = vrot.slane %v98_v38, %v3873_v34  ;;  %v3888_v46 = vadd.f32 %v116_v40, %v113_v39  ;;  %v125_v62 = vmul.f32 %v124_v60, %v3851_v3  ;;  %v131_v1 = vmul.f32 %v130_v61, %v3859_v6  ;;  %v3475_v6 = vld [vmem:[#allocation8 + $0x88] sm:$0xff]   ;;  %3069 = vmatpush3.bf16.msra.mxu0 %v3486_v17  ;;  %v3497_v39 = vld [vmem:[#allocation8 + $0xf8] sm:$0xff]   ;;  %v3501_v5 = vld [vmem:[#allocation8 + $0x1c0] sm:$0xff]  }
  0x40   :  { %v3890_v47 = vadd.f32 %v116_v40, %v114_v41  ;;  %v3893_v48 = vrot.slane %v141_v42, %v3873_v34  ;;  %v3897_v49 = vcombine.high %v3883_v44, %v3883_v44  ;;  %v3900_v50 = vrot.slane %v158_v43, %v3873_v34  ;;  %3070 = vmatprep.subr.bf16.mxu0 %v3488_v18  ;;  %v3496_v38 = vld [vmem:[#allocation8 + $0x68] sm:$0xff]   ;;  %v3499_v43 = vld [vmem:[#allocation8 + $0xb8] sm:$0xff]   ;;  %v3502_v13 = vld [vmem:[#allocation8 + $0x30] sm:$0xff]  }
  0x41   :  { %v3904_v51 = vcombine.high %v3886_v45, %v3886_v45  ;;  %v3915_v55 = vrot.slane %v3888_v46, %v3873_v34  ;;  %v127_v2 = vadd.f32 %v125_v62, %v121_v57  ;;  %3089 = vmatpush3.bf16.msra.mxu1 %v3475_v6  ;;  %v185_v26 = vcombine.high %v3888_v46, %v3888_v46  ;;  %v3498_v42 = vld [vmem:[#allocation8 + $0x28] sm:$0xff]  }
  0x42   :  { %v3909_v53 = vcombine.high %v3893_v48, %v3893_v48  ;;  %v3387_v54 = vpack.i.bf16 %v3883_v44, %v3897_v49  ;;  %v3919_v56 = vcombine.high %v3900_v50, %v3900_v50  ;;  %3090 = vmatprep.subr.bf16.mxu1 %v3477_v12  ;;  %v3962_v37 = vrot.slane %v3890_v47, %v3873_v34 }
  0x43   :  { %v3382_v63 = vpack.i.bf16 %v3893_v48, %v3904_v51  ;;  %v3939_v0 = vcombine.high %v3915_v55, %v3915_v55  ;;  %v3945_v4 = vadd.f32 %v131_v1, %v127_v2  ;;  %3071 = vmatpush3.bf16.msra.mxu0 %v3490_v23  ;;  %v3958_v36 = vrot.slane %v185_v26, %v3873_v34 }
  0x44   :  { %v3377_v58 = vpack.i.bf16 %v3886_v45, %v3909_v53  ;;  %3388 = vrot.lane.b32.xlu1 %v3387_v54, %s3763_s30  ;;  %v3392_v59 = vpack.i.bf16 %v3915_v55, %v3919_v56  ;;  %3072 = vmatprep.subr.bf16.mxu0 %v3492_v27  ;;  %v136_v2 = vstv %s3953_s10  ;;  %v3508_v27 = vld [vmem:[#allocation8 + $0x140] sm:$0xff]  }
  0x45   :  { %v3397_v3 = vpack.i.bf16 %v3900_v50, %v3939_v0  ;;  %3091 = vmatpush3.bf16.msra.mxu1 %v3479_v14  ;;  %v3979_v1 = vcombine.high %v3958_v36, %v3958_v36  ;;  %v137_v15 = vadd.f32 %v136_v2, %v3945_v4 }
  0x46   :  { %3378 = vrot.lane.b32.xlu0 %v3377_v58, %s3763_s30  ;;  %3092 = vmatprep.subr.bf16.mxu1 %v3481_v16 }
  0x47   :  { %3073 = vmatpush3.bf16.msra.mxu0 %v3494_v29  ;;  %v4028_v23 = vrot.slane %v137_v15, %v3873_v34 }
  0x48   :  { %3393 = vrot.lane.b32.xlu1 %v3392_v59, %s3763_s30  ;;  %3074 = vmatprep.subr.bf16.mxu0 %v3496_v38  ;;  %v202_v59 = vcombine.high %v3890_v47, %v3890_v47  ;;  %v3679_v38 = vld [vmem:[%s4457_s0 + $0x18] sm:$0xff] }
  0x49   :  { %3093 = vmatpush3.bf16.msra.mxu1 %v3483_v19  ;;  %v3504_v19 = vld [vmem:[#allocation8 + $0x78] sm:$0xff]  }
  0x4a   :  { %3383 = vrot.lane.b32.xlu0 %v3382_v63, %s3763_s30  ;;  %3094 = vmatprep.subr.bf16.mxu1 %v3485_v20  ;;  %v3975_v63 = vcombine.high %v3962_v37, %v3962_v37  ;;  %v4001_v16 = vrot.slane %v202_v59, %v3873_v34  ;;  %v3407_v20 = vpack.i.bf16 %v3962_v37, %v3979_v1 }
  0x4b   :  { %3075 = vmatpush3.bf16.msra.mxu0 %v3498_v42 }
  0x4d   :  { %3095 = vmatpush3.bf16.msra.mxu1 %v3487_v21 }
  0x4e   :  { %3398 = vrot.lane.b32.xlu0 %v3397_v3, %s3763_s30  ;;  %3096 = vmatprep.subr.bf16.mxu1 %v3489_v22  ;;  %v3500_v3 = vld [vmem:[#allocation8 + $0x70] sm:$0xff]   ;;  %v4025_v22 = vcombine.high %v4001_v16, %v4001_v16 }
  0x4f   :  { %3076 = vmatprep.subr.bf16.mxu0 %v3500_v3 }
  0x50   :  { %3077 = vmatpush3.bf16.msra.mxu0 %v3502_v13 }
  0x51   :  { %3097 = vmatpush3.bf16.msra.mxu1 %v3491_v24  ;;  %3078 = vmatprep.subr.bf16.mxu0 %v3504_v19 }
  0x52   :  { %3098 = vmatprep.subr.bf16.mxu1 %v3493_v28 }
  0x55   :  { %3099 = vmatpush3.bf16.msra.mxu1 %v3495_v30  ;;  %v4053_v30 = vcombine.high %v4028_v23, %v4028_v23 }
  0x56   :  { %3100 = vmatprep.subr.bf16.mxu1 %v3497_v39 }
  0x59   :  { %3101 = vmatpush3.bf16.msra.mxu1 %v3499_v43 }
  0x5a   :  { %3130 = vmatprep.subr.bf16.mxu1 %v3501_v5 }
  0xb6   :  { %v3389_v25 = vpop.permute.xlu1 %3388 }
  0xb7   :  { %v3391_v62 = vunpack.i.h.bf16 %v3389_v25  ;;  %v3390_v7 = vunpack.i.l.bf16 %v3389_v25 }
  0xb8   :  { %v3379_v31 = vpop.permute.xlu0 %3378 }
  0xb9   :  { %v3381_v32 = vunpack.i.h.bf16 %v3379_v31  ;;  %v3380_v33 = vunpack.i.l.bf16 %v3379_v31  ;;  %v320_v17 = vsel %vm319_vm0, %v3391_v62, %v3390_v7 }
  0xba   :  { %v3955_v35 = vpop.permute.xlu1 %3393  ;;  %v4034_v25 = vmax.f32 %v3883_v44, %v320_v17 }
  0xbb   :  { %v3396_v40 = vunpack.i.h.bf16 %v3955_v35  ;;  %v3395_v41 = vunpack.i.l.bf16 %v3955_v35  ;;  %v323_v54 = vsel %vm319_vm0, %v3380_v33, %v3381_v32 }
  0xbc   :  { %v3966_v46 = vpop.permute.xlu0 %3383  ;;  %v3991_v6 = vmax.f32 %v3909_v53, %v323_v54  ;;  %v229_v54 = vcombine.high %v137_v15, %v137_v15 }
  0xbd   :  { %v3386_v57 = vunpack.i.h.bf16 %v3966_v46  ;;  %v3385_v58 = vunpack.i.l.bf16 %v3966_v46  ;;  %v327_v47 = vsel %vm319_vm0, %v3395_v41, %v3396_v40 }
  0xbe   :  { %v4010_v53 = vmax.f32 %v3919_v56, %v327_v47  ;;  %v3506_v56 = vld [vmem:[#allocation8 + $0x38] sm:$0xff]  }
  0xbf   :  { %v324_v8 = vsel %vm319_vm0, %v3381_v32, %v3385_v58  ;;  %v322_v9 = vsel %vm319_vm0, %v3386_v57, %v3380_v33  ;;  %v321_v4 = vsel %vm319_vm0, %v3390_v7, %v3386_v57  ;;  %3079 = vmatpush3.bf16.msra.mxu0 %v3506_v56  ;;  %v3432_v33 = vpack.i.bf16 %v4001_v16, %v4053_v30 }
  0xc0   :  { %v3985_v10 = vpop.permute.xlu0 %3398  ;;  %v3988_v11 = vmax.f32 %v3893_v48, %v322_v9  ;;  %v3994_v12 = vmax.f32 %v3886_v45, %v324_v8  ;;  %v3412_v45 = vpack.i.bf16 %v3958_v36, %v3975_v63  ;;  %3108 = vmatprep.subr.bf16.mxu0 %v3508_v27  ;;  %v3503_v27 = vld [vmem:[#allocation8 + $0x180] sm:$0xff]  }
  0xc1   :  { %v3400_v14 = vunpack.i.l.bf16 %v3985_v10  ;;  %v3401_v26 = vunpack.i.h.bf16 %v3985_v10 }
  0xc2   :  { %419 = vrot.lane.b32.xlu0 %v3988_v11, %s3764_s11  ;;  %v3402_v48 = vpack.i.bf16 %v3994_v12, %v3991_v6 }
  0xc3   :  { %v328_v18 = vsel %vm319_vm0, %v3396_v40, %v3400_v14  ;;  %v326_v28 = vsel %vm319_vm0, %v3401_v26, %v3395_v41  ;;  %v325_v31 = vsel %vm319_vm0, %v3385_v58, %v3401_v26  ;;  %v3680_v40 = vld [vmem:[%s4457_s0 + $0x28] sm:$0xff] }
  0xc4   :  { %3403 = vrot.lane.b32.xlu1 %v3402_v48, %s3764_s11  ;;  %v4021_v21 = vmax.f32 %v3915_v55, %v328_v18  ;;  %v4037_v55 = vmax.f32 %v3897_v49, %v321_v4  ;;  %v3427_v49 = vpack.i.bf16 %v4028_v23, %v4025_v22  ;;  %v4049_v29 = vmax.f32 %v3900_v50, %v326_v28  ;;  %v3678_v50 = vld [vmem:[%s4457_s0 + $0x8] sm:$0xff] }
  0xc5   :  { %v4060_v32 = vmax.f32 %v3904_v51, %v325_v31  ;;  %v122_v35 = vmul.f32 %v3678_v50, %v120_v52  ;;  %v126_v51 = vmul.f32 %v3679_v38, %v124_v60  ;;  %v132_v41 = vmul.f32 %v3680_v40, %v130_v61  ;;  %v3505_v50 = vld [vmem:[#allocation8 + $0x1c8] sm:$0xff]  }
  0xc6   :  { %3413 = vrot.lane.b32.xlu0 %v3412_v45, %s3763_s30  ;;  %v3422_v24 = vpack.i.bf16 %v4021_v21, %v4010_v53  ;;  %v3417_v44 = vpack.i.bf16 %v4034_v25, %v4037_v55  ;;  %v4097_v61 = vrot.slane %v229_v54, %v3873_v34 }
  0xc7   :  { %v128_v39 = vadd.f32 %v126_v51, %v122_v35 }
  0xc8   :  { %3408 = vrot.lane.b32.xlu1 %v3407_v20, %s3763_s30  ;;  %v4115_v4 = vcombine.high %v4097_v61, %v4097_v61 }
  0xc9   :  { %v134_v42 = vadd.f32 %v132_v41, %v128_v39  ;;  %v3507_v41 = vld [vmem:[#allocation8 + $0x188] sm:$0xff]  }
  0xca   :  { %3423 = vrot.lane.b32.xlu0 %v3422_v24, %s3764_s11 }
  0xcb   :  { %v4084_v43 = vadd.f32 %v136_v2, %v134_v42 }
  0xcc   :  { %3418 = vrot.lane.b32.xlu1 %v3417_v44, %s3764_s11 }
  0xcd   :  { %v4092_v58 = vrot.slane %v4084_v43, %v3873_v34 }
  0xce   :  { %3428 = vrot.lane.b32.xlu0 %v3427_v49, %s3763_s30 }
  0xcf   :  { %v4108_v13 = vcombine.high %v4092_v58, %v4092_v58 }
  0xd0   :  { %427 = vrot.lane.b32.xlu1 %v4049_v29, %s3764_s11 }
  0xd1   :  { %v3447_v38 = vpack.i.bf16 %v4097_v61, %v4108_v13 }
  0xd2   :  { %425 = vrot.lane.b32.xlu0 %v4060_v32, %s3764_s11 }
  0xd4   :  { %3433 = vrot.lane.b32.xlu1 %v3432_v33, %s3763_s30 }
 0x134   :  { %v420_v46 = vpop.permute.xlu0 %419 }
 0x136   :  { %v4086_v52 = vpop.permute.xlu1 %3403 }
 0x137   :  { %v3406_v57 = vunpack.i.h.bf16 %v4086_v52  ;;  %v3405_v60 = vunpack.i.l.bf16 %v4086_v52  ;;  %v3542_v52 = vld [vmem:[#allocation8 + $0x2d0] sm:$0xff]  }
 0x138   :  { %v4094_v59 = vpop.permute.xlu0 %3413 }
 0x139   :  { %v3415_v62 = vunpack.i.l.bf16 %v4094_v59  ;;  %v467_v2 = vsel %vm463_vm1, %v3405_v60, %v3406_v57  ;;  %v466_v3 = vsel %vm463_vm1, %v420_v46, %v3405_v60  ;;  %v3416_v15 = vunpack.i.h.bf16 %v4094_v59  ;;  %v3520_v59 = vld [vmem:[#allocation8 + $0x158] sm:$0xff]  }
 0x13a   :  { %v3409_v5 = vpop.permute.xlu1 %3408  ;;  %v514_v7 = vmax.f32 %v3991_v6, %v467_v2  ;;  %v513_v8 = vmax.f32 %v3988_v11, %v466_v3  ;;  %v3442_v2 = vpack.i.bf16 %v4092_v58, %v4115_v4 }
 0x13b   :  { %v3411_v47 = vunpack.i.h.bf16 %v3409_v5  ;;  %v3410_v9 = vunpack.i.l.bf16 %v3409_v5 }
 0x13c   :  { %v4111_v48 = vpop.permute.xlu0 %3423  ;;  %v538_v45 = vmax.f32 %v514_v7, 0.0  ;;  %v537_v17 = vmax.f32 %v513_v8, 0.0  ;;  %v3509_v7 = vld [vmem:[#allocation8 + $0x1d0] sm:$0xff]  }
 0x13d   :  { %v331_v6 = vsel %vm319_vm0, %v3410_v9, %v3411_v47  ;;  %v332_v11 = vsel %vm319_vm0, %v3411_v47, %v3415_v62  ;;  %v3426_v18 = vunpack.i.h.bf16 %v4111_v48  ;;  %v3425_v19 = vunpack.i.l.bf16 %v4111_v48 }
 0x13e   :  { %v3419_v20 = vpop.permute.xlu1 %3418  ;;  %v562_v56 = vpack.c.bf16 %v538_v45, %v538_v45  ;;  %v330_v24 = vsel %vm319_vm0, %v3416_v15, %v3410_v9  ;;  %v561_v26 = vpack.c.bf16 %v537_v17, %v537_v17  ;;  %v4125_v28 = vmax.f32 %v3979_v1, %v331_v6  ;;  %v3511_v6 = vld [vmem:[#allocation8 + $0x190] sm:$0xff]  }
 0x13f   :  { %v3421_v44 = vunpack.i.h.bf16 %v3419_v20  ;;  %v3420_v49 = vunpack.i.l.bf16 %v3419_v20  ;;  %v4128_v31 = vmax.f32 %v3958_v36, %v330_v24  ;;  %v4131_v33 = vmax.f32 %v3962_v37, %v332_v11  ;;  %v3510_v24 = vld [vmem:[#allocation8 + $0x100] sm:$0xff]  }
 0x140   :  { %2192 = vmatprep.mubr.bf16.mxu1 %v562_v56  ;;  %v3429_v35 = vpop.permute.xlu0 %3428  ;;  %v471_v1 = vsel %vm463_vm1, %v3425_v19, %v3426_v18 }
 0x141   :  { %v3431_v51 = vunpack.i.h.bf16 %v3429_v35  ;;  %v3430_v39 = vunpack.i.l.bf16 %v3429_v35  ;;  %435 = vrot.lane.b32.xlu0 %v4128_v31, %s3764_s11  ;;  %2193 = vmatmul.mubr.bf16.vlgmr.msra.gmra.mrb[0].mxu1 %v561_v26  ;;  %v3437_v36 = vpack.i.bf16 %v4131_v33, %v4125_v28  ;;  %v518_v37 = vmax.f32 %v4010_v53, %v471_v1  ;;  %v3515_v35 = vld [vmem:[#allocation8 + $0x198] sm:$0xff]  }
 0x142   :  { %3131 = vmatpush3.bf16.msra.mxu1 %v3503_v27  ;;  %v4145_v40 = vpop.permute.xlu1 %427  ;;  %v465_v42 = vsel %vm463_vm1, %v3420_v49, %v420_v46  ;;  %v464_v54 = vsel %vm463_vm1, %v3421_v44, %v3420_v49  ;;  %v246_v53 = vcombine.high %v4084_v43, %v4084_v43  ;;  %v3512_v44 = vld [vmem:[#allocation8 + $0x148] sm:$0xff]   ;;  %v3513_v49 = vld [vmem:[#allocation8 + $0x1d8] sm:$0xff]  }
 0x143   :  { %3438 = vrot.lane.b32.xlu1 %v3437_v36, %s3764_s11  ;;  %3132 = vmatprep.subr.bf16.mxu1 %v3505_v50  ;;  %v542_v60 = vmax.f32 %v518_v37, 0.0  ;;  %v512_v3 = vmax.f32 %v4037_v55, %v465_v42  ;;  %v511_v8 = vmax.f32 %v4034_v25, %v464_v54  ;;  %v335_v46 = vsel %vm319_vm0, %v3430_v39, %v3431_v51  ;;  %v3518_v37 = vld [vmem:[#allocation8 + $0x110] sm:$0xff]   ;;  %v3521_v54 = vld [vmem:[#allocation8 + $0x1e8] sm:$0xff]  }
 0x144   :  { %v4155_v5 = vpop.permute.xlu0 %425  ;;  %v329_v25 = vsel %vm319_vm0, %v3400_v14, %v3416_v15  ;;  %v4176_v10 = vmax.f32 %v4025_v22, %v335_v46  ;;  %v3514_v22 = vld [vmem:[#allocation8 + $0x108] sm:$0xff]   ;;  %v3529_v46 = vld [vmem:[#allocation8 + $0x1f8] sm:$0xff]  }
 0x145   :  { %v469_v47 = vsel %vm463_vm1, %v4155_v5, %v4145_v40  ;;  %3448 = vrot.lane.b32.xlu0 %v3447_v38, %s3763_s30  ;;  %v566_v9 = vpack.c.bf16 %v542_v60, %v542_v60  ;;  %v536_v45 = vmax.f32 %v512_v3, 0.0  ;;  %v535_v43 = vmax.f32 %v511_v8, 0.0  ;;  %v3522_v60 = vld [vmem:[#allocation8 + $0x118] sm:$0xff]   ;;  %v3526_v8 = vld [vmem:[#allocation8 + $0x120] sm:$0xff]  }
 0x146   :  { %v516_v55 = vmax.f32 %v4060_v32, %v469_v47  ;;  %3133 = vmatpush3.bf16.msra.mxu1 %v3507_v41  ;;  %v4164_v17 = vpop.permute.xlu1 %3433  ;;  %v4173_v32 = vrot.slane %v246_v53, %v3873_v34  ;;  %v4182_v15 = vmax.f32 %v3939_v0, %v329_v25  ;;  %v470_v3 = vsel %vm463_vm1, %v4145_v40, %v3425_v19  ;;  %v3527_v53 = vld [vmem:[#allocation8 + $0x1b0] sm:$0xff]   ;;  %v3528_v47 = vld [vmem:[#allocation8 + $0x168] sm:$0xff]   ;;  %v3536_v19 = vld [vmem:[#allocation8 + $0x2c0] sm:$0xff]  }
 0x147   :  { %v3436_v11 = vunpack.i.h.bf16 %v4164_v17  ;;  %v3435_v20 = vunpack.i.l.bf16 %v4164_v17  ;;  %2272 = vmatprep.mubr.bf16.mxu1 %v566_v9  ;;  %3443 = vrot.lane.b32.xlu1 %v3442_v2, %s3763_s30  ;;  %v560_v56 = vpack.c.bf16 %v536_v45, %v536_v45  ;;  %v559_v27 = vpack.c.bf16 %v535_v43, %v535_v43  ;;  %v3525_v2 = vld [vmem:[#allocation8 + $0x1f0] sm:$0xff]   ;;  %v3531_v9 = vld [vmem:[#allocation8 + $0x1b8] sm:$0xff]   ;;  %v3537_v43 = vld [vmem:[#allocation8 + $0x280] sm:$0xff]  }
 0x148   :  { %v540_v26 = vmax.f32 %v516_v55, 0.0  ;;  %3134 = vmatprep.subr.bf16.mxu1 %v3509_v7  ;;  %v4195_v0 = vcombine.high %v4173_v32, %v4173_v32  ;;  %v517_v7 = vmax.f32 %v4049_v29, %v470_v3  ;;  %v3530_v55 = vld [vmem:[#allocation8 + $0x128] sm:$0xff]   ;;  %v3532_v40 = vld [vmem:[#allocation8 + $0x170] sm:$0xff]   ;;  %v468_v29 = vsel %vm463_vm1, %v3406_v57, %v4155_v5  ;;  %v3540_v57 = vld [vmem:[#allocation8 + $0x240] sm:$0xff]  }
 0x149   :  { %v336_v14 = vsel %vm319_vm0, %v3431_v51, %v3435_v20  ;;  %2152 = vmatprep.mubr.bf16.mxu0 %v560_v56  ;;  %v334_v50 = vsel %vm319_vm0, %v3436_v11, %v3430_v39  ;;  %v3516_v39 = vld [vmem:[#allocation8 + $0x150] sm:$0xff]   ;;  %v333_v36 = vsel %vm319_vm0, %v3415_v62, %v3436_v11  ;;  %v3523_v62 = vld [vmem:[#allocation8 + $0x1a8] sm:$0xff]   ;;  %v515_v56 = vmax.f32 %v3994_v12, %v468_v29 }
 0x14a   :  { %v564_v34 = vpack.c.bf16 %v540_v26, %v540_v26  ;;  %2153 = vmatmul.mubr.bf16.vlgmr.msra.gmra.mrb[0].mxu0 %v559_v27  ;;  %3135 = vmatpush3.bf16.msra.mxu1 %v3511_v6  ;;  %v4186_v38 = vmax.f32 %v4028_v23, %v336_v14  ;;  %v4191_v1 = vmax.f32 %v4001_v16, %v334_v50  ;;  %v3517_v23 = vld [vmem:[#allocation8 + $0x1e0] sm:$0xff]   ;;  %v541_v45 = vmax.f32 %v517_v7, 0.0  ;;  %v3533_v25 = vld [vmem:[#allocation8 + $0x130] sm:$0xff]   ;;  %v3538_v11 = vld [vmem:[#allocation8 + $0x2c8] sm:$0xff]  }
 0x14b   :  { %3109 = vmatpush3.bf16.msra.mxu0 %v3510_v24  ;;  %433 = vrot.lane.b32.xlu1 %v4182_v15, %s3764_s11  ;;  %v3519_v16 = vld [vmem:[#allocation8 + $0x1a0] sm:$0xff]   ;;  %v3457_v41 = vpack.i.bf16 %v4195_v0, %v4173_v32  ;;  %v4208_v42 = vmax.f32 %v3975_v63, %v333_v36  ;;  %v3534_v24 = vld [vmem:[#allocation8 + $0x178] sm:$0xff]   ;;  %v3539_v26 = vld [vmem:[#allocation8 + $0x288] sm:$0xff]  }
 0x14c   :  { %3110 = vmatprep.subr.bf16.mxu0 %v3512_v44  ;;  %2232 = vmatprep.mubr.bf16.mxu0 %v564_v34  ;;  %v3452_v51 = vpack.i.bf16 %v4186_v38, %v4176_v10  ;;  %v3524_v63 = vld [vmem:[#allocation8 + $0x160] sm:$0xff]   ;;  %v565_v6 = vpack.c.bf16 %v541_v45, %v541_v45  ;;  %v3535_v27 = vld [vmem:[#allocation8 + $0x138] sm:$0xff]   ;;  %v539_v44 = vmax.f32 %v515_v56, 0.0  ;;  %v3543_v5 = vld [vmem:[#allocation8 + $0x290] sm:$0xff]  }
 0x14d   :  { %3136 = vmatprep.subr.bf16.mxu1 %v3513_v49  ;;  %v3541_v14 = vld [vmem:[#allocation8 + $0x200] sm:$0xff]   ;;  %v3546_v49 = vld [vmem:[#allocation8 + $0x2d8] sm:$0xff]   ;;  %v3544_v12 = vld [vmem:[#allocation8 + $0x248] sm:$0xff]  }
 0x14e   :  { %3137 = vmatpush3.bf16.msra.mxu1 %v3515_v35  ;;  %3453 = vrot.lane.b32.xlu0 %v3452_v51, %s3764_s11  ;;  %v563_v50 = vpack.c.bf16 %v539_v44, %v539_v44  ;;  %v3547_v34 = vld [vmem:[#allocation8 + $0x298] sm:$0xff]   ;;  %v3545_v35 = vld [vmem:[#allocation8 + $0x208] sm:$0xff]   ;;  %v3548_v51 = vld [vmem:[#allocation8 + $0x250] sm:$0xff]  }
 0x14f   :  { %3111 = vmatpush3.bf16.msra.mxu0 %v3514_v22  ;;  %443 = vrot.lane.b32.xlu1 %v4191_v1, %s3764_s11  ;;  %v3550_v22 = vld [vmem:[#allocation8 + $0x2e0] sm:$0xff]   ;;  %v3554_v36 = vld [vmem:[#allocation8 + $0x2e8] sm:$0xff]  }
 0x150   :  { %3112 = vmatprep.subr.bf16.mxu0 %v3516_v39  ;;  %3138 = vmatprep.subr.bf16.mxu1 %v3517_v23  ;;  %v3551_v39 = vld [vmem:[#allocation8 + $0x2a0] sm:$0xff]   ;;  %v3549_v23 = vld [vmem:[#allocation8 + $0x210] sm:$0xff]   ;;  %v3560_v3 = vld [vmem:[#allocation8 + $0x268] sm:$0xff]  }
 0x151   :  { %v3566_v7 = vld [vmem:[#allocation8 + $0x3c0] sm:$0xff]  }
 0x152   :  { %3139 = vmatpush3.bf16.msra.mxu1 %v3519_v16  ;;  %441 = vrot.lane.b32.xlu0 %v4208_v42, %s3764_s11  ;;  %v3552_v16 = vld [vmem:[#allocation8 + $0x258] sm:$0xff]   ;;  %v3572_v45 = vld [vmem:[#allocation8 + $0x340] sm:$0xff]  }
 0x153   :  { %3113 = vmatpush3.bf16.msra.mxu0 %v3518_v37  ;;  %3458 = vrot.lane.b32.xlu1 %v3457_v41, %s3763_s30  ;;  %v3555_v37 = vld [vmem:[#allocation8 + $0x2a8] sm:$0xff]   ;;  %v3553_v41 = vld [vmem:[#allocation8 + $0x218] sm:$0xff]  }
 0x154   :  { %3114 = vmatprep.subr.bf16.mxu0 %v3520_v59  ;;  %3140 = vmatprep.subr.bf16.mxu1 %v3521_v54  ;;  %v3558_v59 = vld [vmem:[#allocation8 + $0x2f0] sm:$0xff]   ;;  %v3556_v54 = vld [vmem:[#allocation8 + $0x260] sm:$0xff]  }
 0x156   :  { %3141 = vmatpush3.bf16.msra.mxu1 %v3523_v62  ;;  %v3559_v62 = vld [vmem:[#allocation8 + $0x2b0] sm:$0xff]  }
 0x157   :  { %3115 = vmatpush3.bf16.msra.mxu0 %v3522_v60  ;;  %3142 = vmatprep.subr.bf16.mxu1 %v3525_v2  ;;  %v3557_v60 = vld [vmem:[#allocation8 + $0x220] sm:$0xff]   ;;  %v3562_v2 = vld [vmem:[#allocation8 + $0x2f8] sm:$0xff]  }
 0x158   :  { %3116 = vmatprep.subr.bf16.mxu0 %v3524_v63  ;;  %v3563_v63 = vld [vmem:[#allocation8 + $0x2b8] sm:$0xff]  }
 0x15a   :  { %3143 = vmatpush3.bf16.msra.mxu1 %v3527_v53  ;;  %v3561_v53 = vld [vmem:[#allocation8 + $0x228] sm:$0xff]  }
 0x15b   :  { %3117 = vmatpush3.bf16.msra.mxu0 %v3526_v8  ;;  %3144 = vmatprep.subr.bf16.mxu1 %v3529_v46  ;;  %v3564_v8 = vld [vmem:[#allocation8 + $0x270] sm:$0xff]  }
 0x15c   :  { %3118 = vmatprep.subr.bf16.mxu0 %v3528_v47  ;;  %v3565_v46 = vld [vmem:[#allocation8 + $0x230] sm:$0xff]   ;;  %v3568_v47 = vld [vmem:[#allocation8 + $0x278] sm:$0xff]  }
 0x15e   :  { %3145 = vmatpush3.bf16.msra.mxu1 %v3531_v9  ;;  %v3569_v9 = vld [vmem:[#allocation8 + $0x238] sm:$0xff]  }
 0x15f   :  { %3119 = vmatpush3.bf16.msra.mxu0 %v3530_v55  ;;  %3174 = vmatprep.subr.bf16.mxu1 %v3536_v19 }
 0x160   :  { %3120 = vmatprep.subr.bf16.mxu0 %v3532_v40 }
 0x161   :  { %2273 = vmatmul.mubr.bf16.vlgmr.msra.gmra.mrb[4].mxu1 %v565_v6 }
 0x162   :  { %3175 = vmatpush3.bf16.msra.mxu1 %v3537_v43 }
 0x163   :  { %3121 = vmatpush3.bf16.msra.mxu0 %v3533_v25  ;;  %3176 = vmatprep.subr.bf16.mxu1 %v3538_v11 }
 0x164   :  { %3122 = vmatprep.subr.bf16.mxu0 %v3534_v24 }
 0x166   :  { %3177 = vmatpush3.bf16.msra.mxu1 %v3539_v26 }
 0x167   :  { %3123 = vmatpush3.bf16.msra.mxu0 %v3535_v27  ;;  %3178 = vmatprep.subr.bf16.mxu1 %v3542_v52 }
 0x168   :  { %3152 = vmatprep.subr.bf16.mxu0 %v3540_v57 }
 0x16a   :  { %2233 = vmatmul.mubr.bf16.vlgmr.msra.gmra.mrb[4].mxu0 %v563_v50  ;;  %3179 = vmatpush3.bf16.msra.mxu1 %v3543_v5 }
 0x16b   :  { %3153 = vmatpush3.bf16.msra.mxu0 %v3541_v14  ;;  %3180 = vmatprep.subr.bf16.mxu1 %v3546_v49 }
 0x16c   :  { %3154 = vmatprep.subr.bf16.mxu0 %v3544_v12 }
 0x16e   :  { %3181 = vmatpush3.bf16.msra.mxu1 %v3547_v34 }
 0x16f   :  { %3155 = vmatpush3.bf16.msra.mxu0 %v3545_v35  ;;  %3182 = vmatprep.subr.bf16.mxu1 %v3550_v22  ;;  %v3567_v35 = vld [vmem:[#allocation8 + $0x380] sm:$0xff]  }
 0x170   :  { %3156 = vmatprep.subr.bf16.mxu0 %v3548_v51 }
 0x172   :  { %3183 = vmatpush3.bf16.msra.mxu1 %v3551_v39 }
 0x173   :  { %3157 = vmatpush3.bf16.msra.mxu0 %v3549_v23  ;;  %3184 = vmatprep.subr.bf16.mxu1 %v3554_v36  ;;  %v3570_v36 = vld [vmem:[#allocation8 + $0x3c8] sm:$0xff]  }
 0x174   :  { %3158 = vmatprep.subr.bf16.mxu0 %v3552_v16 }
 0x176   :  { %3185 = vmatpush3.bf16.msra.mxu1 %v3555_v37 }
 0x177   :  { %3159 = vmatpush3.bf16.msra.mxu0 %v3553_v41  ;;  %3186 = vmatprep.subr.bf16.mxu1 %v3558_v59  ;;  %v3571_v59 = vld [vmem:[#allocation8 + $0x388] sm:$0xff]  }
 0x178   :  { %3160 = vmatprep.subr.bf16.mxu0 %v3556_v54 }
 0x17a   :  { %3187 = vmatpush3.bf16.msra.mxu1 %v3559_v62 }
 0x17b   :  { %3161 = vmatpush3.bf16.msra.mxu0 %v3557_v60  ;;  %3188 = vmatprep.subr.bf16.mxu1 %v3562_v2  ;;  %v3573_v60 = vld [vmem:[#allocation8 + $0x300] sm:$0xff]   ;;  %v3574_v2 = vld [vmem:[#allocation8 + $0x3d0] sm:$0xff]  }
 0x17c   :  { %3162 = vmatprep.subr.bf16.mxu0 %v3560_v3 }
 0x17e   :  { %3189 = vmatpush3.bf16.msra.mxu1 %v3563_v63  ;;  %v3576_v63 = vld [vmem:[#allocation8 + $0x348] sm:$0xff]  }
 0x17f   :  { %3163 = vmatpush3.bf16.msra.mxu0 %v3561_v53  ;;  %3218 = vmatprep.subr.bf16.mxu1 %v3566_v7 }
 0x180   :  { %3164 = vmatprep.subr.bf16.mxu0 %v3564_v8 }
 0x183   :  { %3165 = vmatpush3.bf16.msra.mxu0 %v3565_v46  ;;  %v3575_v46 = vld [vmem:[#allocation8 + $0x390] sm:$0xff]  }
 0x184   :  { %3166 = vmatprep.subr.bf16.mxu0 %v3568_v47 }
 0x187   :  { %3167 = vmatpush3.bf16.msra.mxu0 %v3569_v9 }
 0x188   :  { %3196 = vmatprep.subr.bf16.mxu0 %v3572_v45 }
 0x1b3   :  { %v436_v55 = vpop.permute.xlu0 %435 }
 0x1b5   :  { %v4223_v19 = vpop.permute.xlu1 %3438 }
 0x1b6   :  { %v3441_v40 = vunpack.i.h.bf16 %v4223_v19  ;;  %v3440_v29 = vunpack.i.l.bf16 %v4223_v19  ;;  %v3599_v19 = vld [vmem:[#allocation8 + $0x338] sm:$0xff]  }
 0x1b7   :  { %v4227_v43 = vpop.permute.xlu0 %3448 }
 0x1b8   :  { %v474_v6 = vsel %vm463_vm1, %v436_v55, %v3440_v29  ;;  %v3450_v25 = vunpack.i.l.bf16 %v4227_v43  ;;  %v475_v11 = vsel %vm463_vm1, %v3440_v29, %v3441_v40  ;;  %v3451_v27 = vunpack.i.h.bf16 %v4227_v43 }
 0x1b9   :  { %v521_v56 = vmax.f32 %v4128_v31, %v474_v6  ;;  %v3444_v24 = vpop.permute.xlu1 %3443  ;;  %v522_v26 = vmax.f32 %v4125_v28, %v475_v11  ;;  %v3580_v11 = vld [vmem:[#allocation8 + $0x350] sm:$0xff]  }
 0x1ba   :  { %v3446_v52 = vunpack.i.h.bf16 %v3444_v24  ;;  %v3445_v44 = vunpack.i.l.bf16 %v3444_v24 }
 0x1bb   :  { %v545_v57 = vmax.f32 %v521_v56, 0.0  ;;  %v546_v5 = vmax.f32 %v522_v26, 0.0  ;;  %v3579_v26 = vld [vmem:[#allocation8 + $0x398] sm:$0xff]  }
 0x1bc   :  { %v340_v14 = vsel %vm319_vm0, %v3446_v52, %v3450_v25  ;;  %v339_v49 = vsel %vm319_vm0, %v3445_v44, %v3446_v52  ;;  %v338_v50 = vsel %vm319_vm0, %v3451_v27, %v3445_v44  ;;  %v3584_v44 = vld [vmem:[#allocation8 + $0x358] sm:$0xff]  }
 0x1bd   :  { %v434_v12 = vpop.permute.xlu1 %433  ;;  %v4243_v31 = vmax.f32 %v4097_v61, %v338_v50  ;;  %v570_v34 = vpack.c.bf16 %v546_v5, %v546_v5  ;;  %v569_v28 = vpack.c.bf16 %v545_v57, %v545_v57  ;;  %v4246_v22 = vmax.f32 %v4115_v4, %v339_v49  ;;  %v3583_v5 = vld [vmem:[#allocation8 + $0x3a0] sm:$0xff]   ;;  %v3590_v50 = vld [vmem:[#allocation8 + $0x3f0] sm:$0xff]  }
 0x1be   :  { %v472_v51 = vsel %vm463_vm1, %v3426_v18, %v434_v12  ;;  %v473_v39 = vsel %vm463_vm1, %v434_v12, %v436_v55  ;;  %v4253_v23 = vmax.f32 %v4092_v58, %v340_v14  ;;  %v337_v58 = vsel %vm319_vm0, %v3435_v20, %v3451_v27  ;;  %v3586_v14 = vld [vmem:[#allocation8 + $0x3e8] sm:$0xff]   ;;  %v3588_v49 = vld [vmem:[#allocation8 + $0x360] sm:$0xff]  }
 0x1bf   :  { %v519_v16 = vmax.f32 %v4021_v21, %v472_v51  ;;  %v520_v61 = vmax.f32 %v4182_v15, %v473_v39  ;;  %451 = vrot.lane.b32.xlu1 %v4243_v31, %s3764_s11  ;;  %2352 = vmatprep.mubr.bf16.mxu1 %v570_v34  ;;  %v4279_v3 = vmax.f32 %v4053_v30, %v337_v58  ;;  %v3578_v30 = vld [vmem:[#allocation8 + $0x3d8] sm:$0xff]   ;;  %v3589_v34 = vld [vmem:[#allocation8 + $0x320] sm:$0xff]  }
 0x1c0   :  { %2353 = vmatmul.mubr.bf16.vlgmr.msra.gmra.mrb[8].mxu1 %v569_v28  ;;  %v4259_v4 = vpop.permute.xlu0 %3453  ;;  %v3462_v48 = vpack.i.bf16 %v4253_v23, %v4246_v22  ;;  %v3592_v28 = vld [vmem:[#allocation8 + $0x368] sm:$0xff]   ;;  %v3594_v39 = vld [vmem:[#allocation8 + $0x3f8] sm:$0xff]  }
 0x1c1   :  { %v543_v18 = vmax.f32 %v519_v16, 0.0  ;;  %v544_v37 = vmax.f32 %v520_v61, 0.0  ;;  %3219 = vmatpush3.bf16.msra.mxu1 %v3567_v35  ;;  %v3456_v21 = vunpack.i.h.bf16 %v4259_v4  ;;  %v3455_v15 = vunpack.i.l.bf16 %v4259_v4  ;;  %v4268_v41 = vpop.permute.xlu1 %443  ;;  %v3591_v35 = vld [vmem:[#allocation8 + $0x3b0] sm:$0xff]  }
 0x1c2   :  { %3463 = vrot.lane.b32.xlu0 %v3462_v48, %s3764_s11  ;;  %3220 = vmatprep.subr.bf16.mxu1 %v3570_v36  ;;  %v3593_v36 = vld [vmem:[#allocation8 + $0x328] sm:$0xff]   ;;  %v3596_v16 = vld [vmem:[#allocation8 + $0x370] sm:$0xff]   ;;  %v3595_v48 = vld [vmem:[#allocation8 + $0x3b8] sm:$0xff]  }
 0x1c3   :  { %v567_v54 = vpack.c.bf16 %v543_v18, %v543_v18  ;;  %v568_v62 = vpack.c.bf16 %v544_v37, %v544_v37  ;;  %v479_v17 = vsel %vm463_vm1, %v3455_v15, %v3456_v21  ;;  %v478_v12 = vsel %vm463_vm1, %v4268_v41, %v3455_v15  ;;  %v3600_v18 = vld [vmem:[#allocation8 + $0x4c0] sm:$0xff]   ;;  %v3597_v37 = vld [vmem:[#allocation8 + $0x330] sm:$0xff]   ;;  %v3598_v15 = vld [vmem:[#allocation8 + $0x378] sm:$0xff]  }
 0x1c4   :  { %v4276_v20 = vpop.permute.xlu0 %441  ;;  %v526_v53 = vmax.f32 %v4176_v10, %v479_v17  ;;  %v3577_v10 = vld [vmem:[#allocation8 + $0x308] sm:$0xff]   ;;  %v525_v51 = vmax.f32 %v4191_v1, %v478_v12  ;;  %v3603_v17 = vld [vmem:[#allocation8 + $0x400] sm:$0xff]  }
 0x1c5   :  { %3221 = vmatpush3.bf16.msra.mxu1 %v3571_v59  ;;  %v477_v7 = vsel %vm463_vm1, %v4276_v20, %v4268_v41  ;;  %2312 = vmatprep.mubr.bf16.mxu0 %v568_v62  ;;  %v3459_v8 = vpop.permute.xlu1 %3458  ;;  %v476_v61 = vsel %vm463_vm1, %v3441_v40, %v4276_v20  ;;  %v3601_v41 = vld [vmem:[#allocation8 + $0x480] sm:$0xff]   ;;  %v3606_v20 = vld [vmem:[#allocation8 + $0x448] sm:$0xff]  }
 0x1c6   :  { %v524_v47 = vmax.f32 %v4208_v42, %v477_v7  ;;  %v3461_v9 = vunpack.i.h.bf16 %v3459_v8  ;;  %449 = vrot.lane.b32.xlu0 %v4279_v3, %s3764_s11  ;;  %2313 = vmatmul.mubr.bf16.vlgmr.msra.gmra.mrb[8].mxu0 %v567_v54  ;;  %v3460_v45 = vunpack.i.l.bf16 %v3459_v8  ;;  %v550_v55 = vmax.f32 %v526_v53, 0.0  ;;  %v3604_v54 = vld [vmem:[#allocation8 + $0x4c8] sm:$0xff]   ;;  %v3602_v40 = vld [vmem:[#allocation8 + $0x440] sm:$0xff]   ;;  %v3612_v53 = vld [vmem:[#allocation8 + $0x4d8] sm:$0xff]  }
 0x1c7   :  { %3197 = vmatpush3.bf16.msra.mxu0 %v3573_v60  ;;  %3222 = vmatprep.subr.bf16.mxu1 %v3574_v2  ;;  %v549_v58 = vmax.f32 %v525_v51, 0.0  ;;  %v523_v1 = vmax.f32 %v4131_v33, %v476_v61  ;;  %v3605_v60 = vld [vmem:[#allocation8 + $0x488] sm:$0xff]   ;;  %v3608_v2 = vld [vmem:[#allocation8 + $0x4d0] sm:$0xff]   ;;  %v2854_v51 = vld [vmem:[%s4461_s4] ss:$0 sm:$0xff] }
 0x1c8   :  { %v548_v29 = vmax.f32 %v524_v47, 0.0  ;;  %v4289_v6 = vmax.f32 %v4195_v0, %v3461_v9  ;;  %3198 = vmatprep.subr.bf16.mxu0 %v3576_v63  ;;  %v341_v42 = vsel %vm319_vm0, %v3450_v25, %v3460_v45  ;;  %v342_v56 = vsel %vm319_vm0, %v3460_v45, %v3461_v9  ;;  %v3582_v0 = vld [vmem:[#allocation8 + $0x3e0] sm:$0xff]   ;;  %v3581_v25 = vld [vmem:[#allocation8 + $0x310] sm:$0xff]   ;;  %v3607_v7 = vld [vmem:[#allocation8 + $0x408] sm:$0xff]  }
 0x1c9   :  { %3223 = vmatpush3.bf16.msra.mxu1 %v3575_v46  ;;  %v574_v24 = vpack.c.bf16 %v550_v55, %v550_v55  ;;  %v4298_v52 = vmax.f32 %v4108_v13, %v341_v42  ;;  %v4301_v43 = vmax.f32 %v4173_v32, %v342_v56  ;;  %v3585_v13 = vld [vmem:[#allocation8 + $0x318] sm:$0xff]   ;;  %v3587_v32 = vld [vmem:[#allocation8 + $0x3a8] sm:$0xff]   ;;  %v573_v59 = vpack.c.bf16 %v549_v58, %v549_v58  ;;  %v3609_v63 = vld [vmem:[#allocation8 + $0x490] sm:$0xff]  }
 0x1ca   :  { %v572_v27 = vpack.c.bf16 %v548_v29, %v548_v29  ;;  %461 = vrot.lane.b32.xlu0 %v4289_v6, %s3764_s11  ;;  %3224 = vmatprep.subr.bf16.mxu1 %v3578_v30  ;;  %v547_v62 = vmax.f32 %v523_v1, 0.0  ;;  %v3610_v8 = vld [vmem:[#allocation8 + $0x450] sm:$0xff]   ;;  %v3613_v46 = vld [vmem:[#allocation8 + $0x498] sm:$0xff]   ;;  %v3616_v47 = vld [vmem:[#allocation8 + $0x4e0] sm:$0xff]  }
 0x1cb   :  { %3199 = vmatpush3.bf16.msra.mxu0 %v3577_v10  ;;  %2432 = vmatprep.mubr.bf16.mxu1 %v574_v24  ;;  %v3467_v57 = vpack.i.bf16 %v4301_v43, %v4298_v52  ;;  %v3611_v9 = vld [vmem:[#allocation8 + $0x410] sm:$0xff]   ;;  %v3614_v30 = vld [vmem:[#allocation8 + $0x458] sm:$0xff]   ;;  %v3617_v45 = vld [vmem:[#allocation8 + $0x4a0] sm:$0xff]  }
 0x1cc   :  { %3200 = vmatprep.subr.bf16.mxu0 %v3580_v11  ;;  %2392 = vmatprep.mubr.bf16.mxu0 %v572_v27  ;;  %v571_v33 = vpack.c.bf16 %v547_v62, %v547_v62  ;;  %v3620_v10 = vld [vmem:[#allocation8 + $0x4e8] sm:$0xff]   ;;  %v3615_v55 = vld [vmem:[#allocation8 + $0x418] sm:$0xff]   ;;  %v3618_v29 = vld [vmem:[#allocation8 + $0x460] sm:$0xff]  }
 0x1cd   :  { %3225 = vmatpush3.bf16.msra.mxu1 %v3579_v26  ;;  %3468 = vrot.lane.b32.xlu1 %v3467_v57, %s3764_s11  ;;  %v3621_v11 = vld [vmem:[#allocation8 + $0x4a8] sm:$0xff]   ;;  %v3624_v42 = vld [vmem:[#allocation8 + $0x4f0] sm:$0xff]   ;;  %v3619_v56 = vld [vmem:[#allocation8 + $0x420] sm:$0xff]  }
 0x1ce   :  { %3226 = vmatprep.subr.bf16.mxu1 %v3582_v0  ;;  %v3622_v24 = vld [vmem:[#allocation8 + $0x468] sm:$0xff]   ;;  %v3625_v26 = vld [vmem:[#allocation8 + $0x4b0] sm:$0xff]   ;;  %v3628_v27 = vld [vmem:[#allocation8 + $0x4f8] sm:$0xff]  }
 0x1cf   :  { %3201 = vmatpush3.bf16.msra.mxu0 %v3581_v25  ;;  %v3623_v0 = vld [vmem:[#allocation8 + $0x428] sm:$0xff]   ;;  %v3626_v25 = vld [vmem:[#allocation8 + $0x470] sm:$0xff]  }
 0x1d0   :  { %3202 = vmatprep.subr.bf16.mxu0 %v3584_v44  ;;  %v3629_v44 = vld [vmem:[#allocation8 + $0x4b8] sm:$0xff]   ;;  %v3627_v57 = vld [vmem:[#allocation8 + $0x430] sm:$0xff]  }
 0x1d1   :  { %3227 = vmatpush3.bf16.msra.mxu1 %v3583_v5  ;;  %v3630_v5 = vld [vmem:[#allocation8 + $0x478] sm:$0xff]  }
 0x1d2   :  { %3228 = vmatprep.subr.bf16.mxu1 %v3586_v14  ;;  %v3765_v14 = vmov 0  }
 0x1d3   :  { %3203 = vmatpush3.bf16.msra.mxu0 %v3585_v13  ;;  %v3631_v13 = vld [vmem:[#allocation8 + $0x438] sm:$0xff]  }
 0x1d4   :  { %3204 = vmatprep.subr.bf16.mxu0 %v3588_v49  ;;  %v3633_v49 = vld [vmem:[#allocation8 + $0x540] sm:$0xff]  }
 0x1d5   :  { %3229 = vmatpush3.bf16.msra.mxu1 %v3587_v32 }
 0x1d6   :  { %3230 = vmatprep.subr.bf16.mxu1 %v3590_v50 }
 0x1d7   :  { %3205 = vmatpush3.bf16.msra.mxu0 %v3589_v34 }
 0x1d8   :  { %3206 = vmatprep.subr.bf16.mxu0 %v3592_v28 }
 0x1d9   :  { %3231 = vmatpush3.bf16.msra.mxu1 %v3591_v35 }
 0x1da   :  { %3232 = vmatprep.subr.bf16.mxu1 %v3594_v39 }
 0x1db   :  { %3207 = vmatpush3.bf16.msra.mxu0 %v3593_v36 }
 0x1dc   :  { %3208 = vmatprep.subr.bf16.mxu0 %v3596_v16 }
 0x1dd   :  { %3233 = vmatpush3.bf16.msra.mxu1 %v3595_v48 }
 0x1de   :  { %3262 = vmatprep.subr.bf16.mxu1 %v3600_v18 }
 0x1df   :  { %3209 = vmatpush3.bf16.msra.mxu0 %v3597_v37 }
 0x1e0   :  { %2433 = vmatmul.mubr.bf16.vlgmr.msra.gmra.mrb[12].mxu1 %v573_v59  ;;  %3210 = vmatprep.subr.bf16.mxu0 %v3598_v15 }
 0x1e1   :  { %3263 = vmatpush3.bf16.msra.mxu1 %v3601_v41 }
 0x1e2   :  { %3264 = vmatprep.subr.bf16.mxu1 %v3604_v54 }
 0x1e3   :  { %3211 = vmatpush3.bf16.msra.mxu0 %v3599_v19 }
 0x1e4   :  { %3240 = vmatprep.subr.bf16.mxu0 %v3602_v40 }
 0x1e5   :  { %3265 = vmatpush3.bf16.msra.mxu1 %v3605_v60 }
 0x1e6   :  { %2393 = vmatmul.mubr.bf16.vlgmr.msra.gmra.mrb[12].mxu0 %v571_v33  ;;  %3266 = vmatprep.subr.bf16.mxu1 %v3608_v2 }
 0x1e7   :  { %3241 = vmatpush3.bf16.msra.mxu0 %v3603_v17 }
 0x1e8   :  { %3242 = vmatprep.subr.bf16.mxu0 %v3606_v20 }
 0x1e9   :  { %3267 = vmatpush3.bf16.msra.mxu1 %v3609_v63 }
 0x1ea   :  { %3268 = vmatprep.subr.bf16.mxu1 %v3612_v53 }
 0x1eb   :  { %3243 = vmatpush3.bf16.msra.mxu0 %v3607_v7 }
 0x1ec   :  { %3244 = vmatprep.subr.bf16.mxu0 %v3610_v8 }
 0x1ed   :  { %3269 = vmatpush3.bf16.msra.mxu1 %v3613_v46 }
 0x1ee   :  { %3270 = vmatprep.subr.bf16.mxu1 %v3616_v47 }
 0x1ef   :  { %3245 = vmatpush3.bf16.msra.mxu0 %v3611_v9 }
 0x1f0   :  { %3246 = vmatprep.subr.bf16.mxu0 %v3614_v30 }
 0x1f1   :  { %3271 = vmatpush3.bf16.msra.mxu1 %v3617_v45 }
 0x1f2   :  { %3272 = vmatprep.subr.bf16.mxu1 %v3620_v10  ;;  %v3632_v10 = vld [vmem:[#allocation8 + $0x580] sm:$0xff]  }
 0x1f3   :  { %3247 = vmatpush3.bf16.msra.mxu0 %v3615_v55 }
 0x1f4   :  { %3248 = vmatprep.subr.bf16.mxu0 %v3618_v29 }
 0x1f5   :  { %3273 = vmatpush3.bf16.msra.mxu1 %v3621_v11  ;;  %v3634_v11 = vld [vmem:[#allocation8 + $0x500] sm:$0xff]  }
 0x1f6   :  { %3274 = vmatprep.subr.bf16.mxu1 %v3624_v42 }
 0x1f7   :  { %3249 = vmatpush3.bf16.msra.mxu0 %v3619_v56  ;;  %v3636_v56 = vld [vmem:[#allocation8 + $0x548] sm:$0xff]  }
 0x1f8   :  { %3250 = vmatprep.subr.bf16.mxu0 %v3622_v24 }
 0x1f9   :  { %3275 = vmatpush3.bf16.msra.mxu1 %v3625_v26  ;;  %v3635_v26 = vld [vmem:[#allocation8 + $0x588] sm:$0xff]  }
 0x1fa   :  { %3276 = vmatprep.subr.bf16.mxu1 %v3628_v27 }
 0x1fb   :  { %3251 = vmatpush3.bf16.msra.mxu0 %v3623_v0 }
 0x1fc   :  { %3252 = vmatprep.subr.bf16.mxu0 %v3626_v25 }
 0x1fd   :  { %3277 = vmatpush3.bf16.msra.mxu1 %v3629_v44 }
 0x1fe   :  { %2560 = vmatprep.subr.bf16.mxu1 %v3765_v14 }
 0x1ff   :  { %3253 = vmatpush3.bf16.msra.mxu0 %v3627_v57  ;;  %v3637_v57 = vld [vmem:[#allocation8 + $0x508] sm:$0xff]  }
 0x200   :  { %3254 = vmatprep.subr.bf16.mxu0 %v3630_v5  ;;  %v3639_v5 = vld [vmem:[#allocation8 + $0x550] sm:$0xff]  }
 0x203   :  { %3255 = vmatpush3.bf16.msra.mxu0 %v3631_v13 }
 0x204   :  { %3284 = vmatprep.subr.bf16.mxu0 %v3633_v49 }
 0x214   :  { %v3102_v32 = vpop.f32.mrb[0].mxu1 }
 0x215   :  { %v3103_v50 = vpop.f32.mrb[1].mxu1 }
 0x216   :  { %v3104_v12 = vadd.f32 %v3103_v50, %v3102_v32  ;;  %v3105_v34 = vpop.f32.mrb[2].mxu1  ;;  %v3638_v32 = vld [vmem:[#allocation8 + $0x590] sm:$0xff]  }
 0x217   :  { %v3106_v28 = vpop.f32.mrb[3].mxu1 }
 0x218   :  { %v3642_v28 = vld [vmem:[#allocation8 + $0x558] sm:$0xff]  }
 0x21d   :  { %v3080_v35 = vpop.f32.mrb[0].mxu0 }
 0x21e   :  { %v3081_v39 = vpop.f32.mrb[1].mxu0 }
 0x21f   :  { %v3082_v36 = vadd.f32 %v3081_v39, %v3080_v35  ;;  %v3083_v16 = vpop.f32.mrb[2].mxu0  ;;  %v3641_v35 = vld [vmem:[#allocation8 + $0x598] sm:$0xff]  }
 0x220   :  { %v3084_v61 = vpop.f32.mrb[3].mxu0  ;;  %v3643_v39 = vld [vmem:[#allocation8 + $0x518] sm:$0xff]   ;;  %v3644_v16 = vld [vmem:[#allocation8 + $0x5a0] sm:$0xff]  }
 0x221   :  { %v2155_v48 = vadd.f32 %v3082_v36, %v2854_v51  ;;  %v3645_v36 = vld [vmem:[#allocation8 + $0x560] sm:$0xff]   ;;  %v3648_v61 = vld [vmem:[#allocation8 + $0x568] sm:$0xff]  }
 0x223   :  { %v2195_v58 = vadd.f32 %v3104_v12, %v2155_v48  ;;  %v3640_v12 = vld [vmem:[#allocation8 + $0x510] sm:$0xff]   ;;  %v3647_v48 = vld [vmem:[#allocation8 + $0x5a8] sm:$0xff]  }
 0x231   :  { %v452_v59 = vpop.permute.xlu1 %451 }
 0x234   :  { %v4320_v18 = vpop.permute.xlu0 %3463  ;;  %v3146_v37 = vpop.f32.mrb[4].mxu1 }
 0x235   :  { %v3466_v1 = vunpack.i.h.bf16 %v4320_v18  ;;  %v3465_v15 = vunpack.i.l.bf16 %v4320_v18  ;;  %v3147_v41 = vpop.f32.mrb[5].mxu1  ;;  %v3656_v18 = vld [vmem:[#allocation8 + $0x5c0] sm:$0xff]  }
 0x236   :  { %v3148_v54 = vadd.f32 %v3147_v41, %v3146_v37  ;;  %v3149_v19 = vpop.f32.mrb[6].mxu1  ;;  %v3651_v37 = vld [vmem:[#allocation8 + $0x570] sm:$0xff]  }
 0x237   :  { %v482_v62 = vsel %vm463_vm1, %v452_v59, %v3465_v15  ;;  %v3150_v40 = vpop.f32.mrb[7].mxu1  ;;  %v483_v60 = vsel %vm463_vm1, %v3465_v15, %v3466_v1  ;;  %v3650_v41 = vld [vmem:[#allocation8 + $0x5b0] sm:$0xff]   ;;  %v3654_v19 = vld [vmem:[#allocation8 + $0x578] sm:$0xff]  }
 0x238   :  { %v529_v2 = vmax.f32 %v4243_v31, %v482_v62  ;;  %v450_v17 = vpop.permute.xlu0 %449  ;;  %v530_v33 = vmax.f32 %v4246_v22, %v483_v60  ;;  %v3653_v62 = vld [vmem:[#allocation8 + $0x5b8] sm:$0xff]  }
 0x239   :  { %v480_v20 = vsel %vm463_vm1, %v3456_v21, %v450_v17  ;;  %v481_v63 = vsel %vm463_vm1, %v450_v17, %v452_v59  ;;  %v3652_v59 = vld [vmem:[#allocation8 + $0x530] sm:$0xff]   ;;  %v3655_v40 = vld [vmem:[#allocation8 + $0x538] sm:$0xff]  }
 0x23a   :  { %v553_v53 = vmax.f32 %v529_v2, 0.0  ;;  %v527_v7 = vmax.f32 %v4186_v38, %v480_v20  ;;  %v528_v8 = vmax.f32 %v4279_v3, %v481_v63  ;;  %v554_v46 = vmax.f32 %v530_v33, 0.0  ;;  %v3657_v2 = vld [vmem:[#allocation8 + $0x5c8] sm:$0xff]   ;;  %v3659_v17 = vld [vmem:[#allocation8 + $0x5d8] sm:$0xff]  }
 0x23b   :  { %v3766_v20 = vmov 65535  }
 0x23c   :  { %v551_v47 = vmax.f32 %v527_v7, 0.0  ;;  %v552_v9 = vmax.f32 %v528_v8, 0.0  ;;  %v4336_v30 = vpop.permute.xlu0 %461  ;;  %v578_v31 = vpack.c.bf16 %v554_v46, %v554_v46  ;;  %v577_v45 = vpack.c.bf16 %v553_v53, %v553_v53  ;;  %v3660_v53 = vld [vmem:[#allocation8 + $0x5e0] sm:$0xff]   ;;  %v3661_v7 = vld [vmem:[#allocation8 + $0x5e8] sm:$0xff]  }
 0x23d   :  { %v3124_v22 = vpop.f32.mrb[4].mxu0  ;;  %v534_v4 = vmax.f32 %v4289_v6, %v4336_v30  ;;  %v2115_v63 = vsel %vm2113_vm3, 4294967295, %v3766_v20 }
 0x23e   :  { %v575_v21 = vpack.c.bf16 %v551_v47, %v551_v47  ;;  %v576_v55 = vpack.c.bf16 %v552_v9, %v552_v9  ;;  %v3125_v29 = vpop.f32.mrb[5].mxu0  ;;  %2512 = vmatprep.mubr.bf16.mxu1 %v578_v31  ;;  %v2116_v46 = vsel %vm2114_vm4, %v2115_v63, 0 }
 0x23f   :  { %v558_v38 = vmax.f32 %v534_v4, 0.0  ;;  %v3126_v42 = vadd.f32 %v3125_v29, %v3124_v22  ;;  %v3127_v3 = vpop.f32.mrb[6].mxu0  ;;  %2513 = vmatmul.mubr.bf16.vlgmr.msra.gmra.mrb[16].mxu1 %v577_v45  ;;  %v4340_v25 = vpop.permute.xlu1 %3468  ;;  %v2118_v47 = vand.u32 %v3661_v7, %v2116_v46 }
 0x240   :  { %2561 = vmatpush1.bf16.msra.mxu1 %v3632_v10  ;;  %v3128_v24 = vpop.f32.mrb[7].mxu0  ;;  %2472 = vmatprep.mubr.bf16.mxu0 %v576_v55  ;;  %v3471_v6 = vunpack.i.h.bf16 %v4340_v25  ;;  %v3470_v44 = vunpack.i.l.bf16 %v4340_v25  ;;  %v3767_v55 = vmov 0.0  }
 0x241   :  { %v582_v27 = vpack.c.bf16 %v558_v38, %v558_v38  ;;  %v2235_v0 = vadd.f32 %v3126_v42, %v2195_v58  ;;  %2473 = vmatmul.mubr.bf16.vlgmr.msra.gmra.mrb[16].mxu0 %v575_v21  ;;  %2562 = vmatprep.subr.bf16.mxu1 %v3765_v14  ;;  %v3649_v58 = vld [vmem:[#allocation8 + $0x528] sm:$0xff]  }
 0x242   :  { %3285 = vmatpush3.bf16.msra.mxu0 %v3634_v11  ;;  %v485_v49 = vsel %vm463_vm1, %v3470_v44, %v3471_v6  ;;  %v484_v15 = vsel %vm463_vm1, %v3466_v1, %v3470_v44  ;;  %v486_v33 = vsel %vm463_vm1, %v3471_v6, %v4336_v30  ;;  %v3664_v6 = vld [vmem:[%s4462_s5 + $0x10] sm:$0xff]  }
 0x243   :  { %3286 = vmatprep.subr.bf16.mxu0 %v3636_v56  ;;  %3045 = vmatprep.mubr.msk.bf16.mxu1 %vm2109_vm2, %v582_v27  ;;  %v4345_v13 = vadd.f32 %v3148_v54, %v2235_v0  ;;  %v532_v50 = vmax.f32 %v4298_v52, %v485_v49  ;;  %v3646_v52 = vld [vmem:[#allocation8 + $0x520] sm:$0xff]   ;;  %v531_v54 = vmax.f32 %v4253_v23, %v484_v15  ;;  %v3658_v23 = vld [vmem:[#allocation8 + $0x5d0] sm:$0xff]  }
 0x244   :  { %2563 = vmatpush1.bf16.msra.mxu1 %v3635_v26  ;;  %v533_v8 = vmax.f32 %v4301_v43, %v486_v33  ;;  %v3662_v43 = vld [vmem:[%s4462_s5] sm:$0xff]   ;;  %v3663_v26 = vld [vmem:[%s4462_s5 + $0x8] sm:$0xff]  }
 0x245   :  { %2564 = vmatprep.subr.bf16.mxu1 %v3765_v14  ;;  %v556_v34 = vmax.f32 %v532_v50, 0.0  ;;  %v555_v60 = vmax.f32 %v531_v54, 0.0 }
 0x246   :  { %3287 = vmatpush3.bf16.msra.mxu0 %v3637_v57  ;;  %v557_v9 = vmax.f32 %v533_v8, 0.0 }
 0x247   :  { %3288 = vmatprep.subr.bf16.mxu0 %v3639_v5  ;;  %v580_v51 = vpack.c.bf16 %v556_v34, %v556_v34  ;;  %v579_v1 = vpack.c.bf16 %v555_v60, %v555_v60  ;;  %v3665_v5 = vld [vmem:[%s4462_s5 + $0x18] sm:$0xff]  }
 0x248   :  { %2565 = vmatpush1.bf16.msra.mxu1 %v3638_v32  ;;  %v581_v31 = vpack.c.bf16 %v557_v9, %v557_v9 }
 0x249   :  { %2566 = vmatprep.subr.bf16.mxu1 %v3765_v14  ;;  %2552 = vmatprep.mubr.bf16.mxu0 %v580_v51  ;;  %v3669_v51 = vld [vmem:[%s4462_s5 + $0x38] sm:$0xff]  }
 0x24a   :  { %3289 = vmatpush3.bf16.msra.mxu0 %v3640_v12  ;;  %v3666_v12 = vld [vmem:[%s4462_s5 + $0x20] sm:$0xff]  }
 0x24b   :  { %3290 = vmatprep.subr.bf16.mxu0 %v3642_v28  ;;  %v3667_v28 = vld [vmem:[%s4462_s5 + $0x28] sm:$0xff]  }
 0x24c   :  { %2567 = vmatpush1.bf16.msra.mxu1 %v3641_v35  ;;  %v3668_v35 = vld [vmem:[%s4462_s5 + $0x30] sm:$0xff]  }
 0x24d   :  { %2568 = vmatprep.subr.bf16.mxu1 %v3765_v14 }
 0x24e   :  { %3291 = vmatpush3.bf16.msra.mxu0 %v3643_v39  ;;  %v3670_v39 = vld [vmem:[%s4464_s7] sm:$0xff]  }
 0x24f   :  { %3292 = vmatprep.subr.bf16.mxu0 %v3645_v36  ;;  %v3671_v36 = vld [vmem:[%s4464_s7 + $0x8] sm:$0xff]  }
 0x250   :  { %2569 = vmatpush1.bf16.msra.mxu1 %v3644_v16  ;;  %v3672_v16 = vld [vmem:[%s4464_s7 + $0x10] sm:$0xff]  }
 0x251   :  { %2570 = vmatprep.subr.bf16.mxu1 %v3765_v14 }
 0x252   :  { %3293 = vmatpush3.bf16.msra.mxu0 %v3646_v52  ;;  %v3673_v52 = vld [vmem:[%s4464_s7 + $0x18] sm:$0xff]  }
 0x253   :  { %3294 = vmatprep.subr.bf16.mxu0 %v3648_v61  ;;  %v3674_v61 = vld [vmem:[%s4464_s7 + $0x20] sm:$0xff]  }
 0x254   :  { %2571 = vmatpush1.bf16.msra.mxu1 %v3647_v48  ;;  %v3675_v48 = vld [vmem:[%s4464_s7 + $0x28] sm:$0xff]  }
 0x255   :  { %2572 = vmatprep.subr.bf16.mxu1 %v3765_v14 }
 0x256   :  { %3295 = vmatpush3.bf16.msra.mxu0 %v3649_v58 }
 0x257   :  { %3296 = vmatprep.subr.bf16.mxu0 %v3651_v37 }
 0x258   :  { %2573 = vmatpush1.bf16.msra.mxu1 %v3650_v41 }
 0x259   :  { %2574 = vmatprep.subr.bf16.mxu1 %v3765_v14 }
 0x25a   :  { %3297 = vmatpush3.bf16.msra.mxu0 %v3652_v59 }
 0x25b   :  { %3298 = vmatprep.subr.bf16.mxu0 %v3654_v19 }
 0x25c   :  { %2575 = vmatpush1.bf16.msra.mxu1 %v3653_v62 }
 0x25d   :  { %2576 = vmatprep.subr.bf16.mxu1 %v3765_v14 }
 0x25e   :  { %3299 = vmatpush3.bf16.msra.mxu0 %v3655_v40 }
 0x25f   :  { %3324 = vmatprep.subr.bf16.mxu0 %v3767_v55 }
 0x260   :  { %2577 = vmatpush1.bf16.msra.mxu1 %v3656_v18 }
 0x261   :  { %2553 = vmatmul.mubr.bf16.vlgmr.msra.gmra.mrb[20].mxu0 %v579_v1  ;;  %2578 = vmatprep.subr.bf16.mxu1 %v3765_v14 }
 0x262   :  { %3325 = vmatpush3.bf16.msra.mxu0 %v3662_v43  ;;  %3340 = vmatprep.mubr.msk.bf16.mxu0 %vm3768_vm5, %v3767_v55 }
 0x263   :  { %3326 = vmatprep.subr.bf16.mxu0 %v3767_v55 }
 0x264   :  { %2579 = vmatpush1.bf16.msra.mxu1 %v3657_v2 }
 0x265   :  { %2580 = vmatprep.subr.bf16.mxu1 %v3765_v14 }
 0x266   :  { %3327 = vmatpush3.bf16.msra.mxu0 %v3663_v26 }
 0x267   :  { %3328 = vmatprep.subr.bf16.mxu0 %v3767_v55 }
 0x268   :  { %2581 = vmatpush1.bf16.msra.mxu1 %v3658_v23 }
 0x269   :  { %2582 = vmatprep.subr.bf16.mxu1 %v3765_v14 }
 0x26a   :  { %3329 = vmatpush3.bf16.msra.mxu0 %v3664_v6 }
 0x26b   :  { %3330 = vmatprep.subr.bf16.mxu0 %v3767_v55 }
 0x26c   :  { %2583 = vmatpush1.bf16.msra.mxu1 %v3659_v17 }
 0x26d   :  { %2584 = vmatprep.subr.bf16.mxu1 %v3765_v14 }
 0x26e   :  { %3331 = vmatpush3.bf16.msra.mxu0 %v3665_v5 }
 0x26f   :  { %3332 = vmatprep.subr.bf16.mxu0 %v3767_v55 }
 0x270   :  { %2585 = vmatpush1.bf16.msra.mxu1 %v3660_v53 }
 0x271   :  { %2586 = vmatprep.subr.bf16.mxu1 %v3765_v14 }
 0x272   :  { %3333 = vmatpush3.bf16.msra.mxu0 %v3666_v12 }
 0x273   :  { %3334 = vmatprep.subr.bf16.mxu0 %v3767_v55 }
 0x274   :  { %2587 = vmatpush1.bf16.msra.mxu1 %v2118_v47 }
 0x275   :  { %3344 = vmatprep.subr.bf16.mxu1 %v3767_v55 }
 0x276   :  { %3335 = vmatpush3.bf16.msra.mxu0 %v3667_v28 }
 0x277   :  { %2593 = vmatmul.mubr.bf16.vlgmr.msra.gmra.mrb[20].mxu1 %v581_v31  ;;  %3336 = vmatprep.subr.bf16.mxu0 %v3767_v55 }
 0x278   :  { %3360 = vmatprep.mubr.msk.bf16.mxu1 %vm3768_vm5, %v3767_v55  ;;  %3345 = vmatpush3.bf16.msra.mxu1 %v3670_v39 }
 0x279   :  { %3346 = vmatprep.subr.bf16.mxu1 %v3767_v55 }
 0x27a   :  { %3337 = vmatpush3.bf16.msra.mxu0 %v3668_v35 }
 0x27b   :  { %3338 = vmatprep.subr.bf16.mxu0 %v3767_v55 }
 0x27c   :  { %3347 = vmatpush3.bf16.msra.mxu1 %v3671_v36 }
 0x27d   :  { %3348 = vmatprep.subr.bf16.mxu1 %v3767_v55 }
 0x27e   :  { %3339 = vmatpush3.bf16.msra.mxu0 %v3669_v51 }
 0x280   :  { %3349 = vmatpush3.bf16.msra.mxu1 %v3672_v16 }
 0x281   :  { %3350 = vmatprep.subr.bf16.mxu1 %v3767_v55 }
 0x284   :  { %3351 = vmatpush3.bf16.msra.mxu1 %v3673_v52 }
 0x285   :  { %3352 = vmatprep.subr.bf16.mxu1 %v3767_v55 }
 0x288   :  { %3353 = vmatpush3.bf16.msra.mxu1 %v3674_v61 }
 0x289   :  { %3354 = vmatprep.subr.bf16.mxu1 %v3767_v55 }
 0x28c   :  { %3355 = vmatpush3.bf16.msra.mxu1 %v3675_v48 }
 0x28d   :  { %3356 = vmatprep.subr.bf16.mxu1 %v3767_v55 }
 0x293   :  { %v3190_v30 = vpop.f32.mrb[8].mxu1 }
 0x294   :  { %v3191_v45 = vpop.f32.mrb[9].mxu1 }
 0x295   :  { %v3192_v10 = vadd.f32 %v3191_v45, %v3190_v30  ;;  %v3193_v22 = vpop.f32.mrb[10].mxu1  ;;  %v3676_v30 = vld [vmem:[%s4464_s7 + $0x30] sm:$0xff]   ;;  %v3677_v45 = vld [vmem:[%s4464_s7 + $0x38] sm:$0xff]  }
 0x296   :  { %v3194_v4 = vpop.f32.mrb[11].mxu1  ;;  %3357 = vmatpush3.bf16.msra.mxu1 %v3676_v30 }
 0x297   :  { %3358 = vmatprep.subr.bf16.mxu1 %v3767_v55  ;;  %v3055_v55 = vld [vmem:[%s4465_s8] ss:$0 sm:$0xff] }
 0x299   :  { %v3168_v21 = vpop.f32.mrb[8].mxu0 }
 0x29a   :  { %v3169_v29 = vpop.f32.mrb[9].mxu0  ;;  %3359 = vmatpush3.bf16.msra.mxu1 %v3677_v45 }
 0x29b   :  { %v3170_v14 = vadd.f32 %v3169_v29, %v3168_v21  ;;  %v3171_v11 = vpop.f32.mrb[10].mxu0 }
 0x29c   :  { %v3172_v38 = vpop.f32.mrb[11].mxu0 }
 0x29d   :  { %v2315_v42 = vadd.f32 %v3170_v14, %v4345_v13 }
 0x29f   :  { %v2355_v3 = vadd.f32 %v3192_v10, %v2315_v42  ;;  %v3046_v10 = vld [vmem:[%s4463_s6] ss:$0 sm:$0xff]  ;;  %s3727_s6 = scalar_lea.vmem %s2834_s25, 32 }
 0x2a0   :  { %p3728_p4 = scmp.ne.s32.totalorder %s2834_s25, %s3727_s6  ;;  %p3733_p6 = scmp.lt.s32.totalorder %s3727_s6, %s3727_s6 }
 0x2a2   :  { %p3734_p7 = por %p3733_p6, %p3732_p5 }
 0x2a4   :  { %p3735_p8 = pnand %p3734_p7, %p3728_p4 }
 0x2b3   :  { %v3234_v56 = vpop.f32.mrb[12].mxu1 }
 0x2b4   :  { %v3235_v24 = vpop.f32.mrb[13].mxu1 }
 0x2b5   :  { %v3236_v27 = vadd.f32 %v3235_v24, %v3234_v56  ;;  %v3237_v0 = vpop.f32.mrb[14].mxu1 }
 0x2b6   :  { %v3238_v25 = vpop.f32.mrb[15].mxu1 }
 0x2b9   :  { %v3212_v44 = vpop.f32.mrb[12].mxu0 }
 0x2ba   :  { %v3213_v57 = vpop.f32.mrb[13].mxu0 }
 0x2bb   :  { %v3214_v13 = vadd.f32 %v3213_v57, %v3212_v44  ;;  %v3215_v49 = vpop.f32.mrb[14].mxu0 }
 0x2bc   :  { %v3216_v32 = vpop.f32.mrb[15].mxu0 }
 0x2bd   :  { %v2395_v50 = vadd.f32 %v3214_v13, %v2355_v3 }
 0x2bf   :  { %v2435_v34 = vadd.f32 %v3236_v27, %v2395_v50 }
 0x312   :  { %v3278_v58 = vpop.f32.mrb[16].mxu1 }
 0x313   :  { %v3279_v37 = vpop.f32.mrb[17].mxu1 }
 0x314   :  { %v3280_v15 = vadd.f32 %v3279_v37, %v3278_v58  ;;  %v3256_v41 = vpop.f32.mrb[16].mxu0  ;;  %v3281_v59 = vpop.f32.mrb[18].mxu1 }
 0x315   :  { %v3257_v54 = vpop.f32.mrb[17].mxu0  ;;  %v3282_v19 = vpop.f32.mrb[19].mxu1 }
 0x316   :  { %v3258_v62 = vadd.f32 %v3257_v54, %v3256_v41  ;;  %v3259_v40 = vpop.f32.mrb[18].mxu0 }
 0x317   :  { %v3260_v60 = vpop.f32.mrb[19].mxu0 }
 0x318   :  { %v2475_v18 = vadd.f32 %v3258_v62, %v2435_v34 }
 0x31a   :  { %v2515_v1 = vadd.f32 %v3280_v15, %v2475_v18 }
 0x334   :  { %v3300_v2 = vpop.f32.mrb[20].mxu0 }
 0x335   :  { %v3301_v23 = vpop.f32.mrb[21].mxu0 }
 0x336   :  { %v3302_v17 = vadd.f32 %v3301_v23, %v3300_v2  ;;  %v3303_v33 = vpop.f32.mrb[22].mxu0 }
 0x337   :  { %v3304_v20 = vpop.f32.mrb[23].mxu0 }
 0x338   :  { %v2555_v63 = vadd.f32 %v3302_v17, %v2515_v1 }
 0x34a   :  { %v2594_v53 = vpop.f32.mrb[20].mxu1 }
 0x34b   :  { %v2595_v7 = vadd.f32 %v2594_v53, %v2555_v63  ;;  %v2596_v8 = vpop.f32.mrb[21].mxu1 }
 0x34c   :  { %v2597_v46 = vpop.f32.mrb[22].mxu1 }
 0x34d   :  { %v2600_v47 = vmax.f32 %v2595_v7, 0.0  ;;  %v2598_v9 = vpop.f32.mrb[23].mxu1 }
 0x34f   :  { %v2601_v31 = vpack.c.bf16 %v2600_v47, %v2600_v47 }
 0x351   :  { %3341 = vmatmul.mubr.bf16.vlgmr.msra.gmra.mrb[24].mxu0 %v2601_v31 }
 0x424   :  { %v2707_v22 = vpop.f32.mrb[24].mxu0 }
 0x425   :  { %v2708_v4 = vadd.f32 %v3046_v10, %v2707_v22  ;;  %v3342_v43 = vpop.f32.mrb[25].mxu0 }
 0x426   :  { %v2710_v21 = vpop.f32.mrb[26].mxu0 }
 0x427   :  { %v2713_v29 = vmax.f32 %v2708_v4, 0.0  ;;  %v3343_v14 = vpop.f32.mrb[27].mxu0 }
 0x429   :  { %v2714_v11 = vpack.c.bf16 %v2713_v29, %v2713_v29 }
 0x42b   :  { %3361 = vmatmul.mubr.bf16.vlgmr.msra.gmra.mrb[24].mxu1 %v2714_v11 }
 0x4fe   :  { %v2820_v38 = vpop.f32.mrb[24].mxu1 }
 0x4ff   :  { %v2821_v42 = vadd.f32 %v3055_v55, %v2820_v38  ;;  %v3362_v3 = vpop.f32.mrb[25].mxu1 }
 0x500   :  { %v2823_v56 = vpop.f32.mrb[26].mxu1 }
 0x501   :  { %2826 = vst [vmem:[#allocation9] sm:$0x3] %v2821_v42  ;;  %v3363_v24 = vpop.f32.mrb[27].mxu1 }
 0x502   :  { %3738 = shalt.err (!%p3735_p8)
}
 0x503   :  { %s3739_s8 = scalar_lea.hbm %s4466_s9, 32 }
 0x504   :  { %p3740_p9 = scmp.ne.s32.totalorder %s4466_s9, %s3739_s8  ;;  %p3743_p10 = scmp.lt.u32.totalorder %s3739_s8, %s4466_s9 }
 0x506   :  { %p3745_p11 = pnand %p3743_p10, %p3740_p9 }
 0x508   :  { %3748 = shalt.err (!%p3745_p11)
}
 0x509   :  { %2836 = dma.vmem_to_hbm [thread:$0]  %s2834_s25, 32, %s4466_s9, [#allocation4]  }
 0x50a   :  { %3755 = dma.done.wait [#allocation4], 32  }
 0x50b   :  { %3756 = vsyncadd [#allocation4], 4294967264 }
 0x50c   :  { %2840 = vsyncpa [#allocation3], 1 }
 0x50d   :  { %2841 = vsyncpa [#allocation4], 1 }
 0x50e   :  { %2842 = vsyncpa [#allocation5], 1 }
 0x50f   :  { %2843 = vsyncpa [#allocation7], 1 }

</bundles_post_ra>
